<compile_context>
chip_gen: v7x
topology: tpu7x:2x2x1
jax: 0.10.0
libtpu: 0.0.40
codegen_flags: <defaults>
</compile_context>

<pallas_src>
import functools

import jax
import jax.numpy as jnp
from jax.experimental import pallas as pl
from jax.experimental.pallas import tpu as pltpu


LANE = 128                              # all feature axes padded to this
VMEM_LIMIT_BYTES = 48 * 1024 * 1024     # v7x-safe (64 MiB physical), >> v5e 16 MiB default
X_RESIDENT_BYTES = 8 * 1024 * 1024      # keep X fully resident in VMEM below this


def _round_up(n, m):
    return (n + m - 1) // m * m


def _pad2(a, rows, cols):
    r, c = a.shape
    return jnp.pad(a, ((0, rows - r), (0, cols - c)))


def _choose_tiles(n):
    """Pick (TILE_M, TILE_K, padded node count).

    TILE_K up to 512: aggregation is HBM-bound streaming of dense A_hat; wide
    reduction tiles get ~85% of HBM roofline vs ~30% at 128 and cut grid-step
    overhead + f32 accumulator read-modify-write passes.
    TILE_M = 256 matches the v6e/v7x 256x256 MXU, but only when >= 2 row tiles
    remain so the "parallel" row axis can still be split across v7x's 2 TCs.
    """
    n_p = 128 if n <= 128 else _round_up(n, 256)
    tile_m = 256 if n_p >= 512 else 128
    if n_p % 512 == 0:
        tile_k = 512
    elif n_p % 256 == 0:
        tile_k = 256
    else:
        tile_k = 128
    return tile_m, tile_k, n_p


# -------------------- fused layer kernel: act(A @ (X W) + b) -----------------
def _gcn_layer_kernel(x_ref, w_ref, a_ref, b_ref, o_ref, acc_ref,
                      *, activation, valid_cols, tile_k, x_resident):
    k = pl.program_id(1)

    @pl.when(k == 0)
    def _():
        # Fold the bias add into the accumulator init (no extra VPU pass).
        acc_ref[...] = jnp.broadcast_to(
            b_ref[...].astype(jnp.float32), acc_ref.shape
        )

    # Feature transform for this source-node tile, computed on the fly so the
    # XW intermediate never touches HBM.
    if x_resident:
        start = pl.multiple_of(k * tile_k, tile_k)
        x_blk = x_ref[pl.ds(start, tile_k), :]
    else:
        x_blk = x_ref[...]
    xw = jnp.dot(
        x_blk, w_ref[...], preferred_element_type=jnp.float32
    ).astype(jnp.bfloat16)

    # Aggregation: acc += A_hat[row tile, k tile] @ XW[k tile]
    acc_ref[...] += jnp.dot(a_ref[...], xw, preferred_element_type=jnp.float32)

    @pl.when(k == pl.num_programs(1) - 1)
    def _():
        acc = acc_ref[...]
        if activation == "relu":
            o_ref[...] = jnp.maximum(acc, 0.0).astype(o_ref.dtype)
        elif activation == "log_softmax":
            # Mask padded class lanes; exponentiate the masked input so padded
            # lanes contribute exp(-inf) = 0 (no transient inf).
            lane = jax.lax.broadcasted_iota(jnp.int32, acc.shape, 1)
            mask = lane < valid_cols
            masked = jnp.where(mask, acc, -jnp.inf)
            m = jnp.max(masked, axis=1, keepdims=True)
            e = jnp.exp(masked - m)
            ls = jnp.log(jnp.sum(e, axis=1, keepdims=True))
            o_ref[...] = (acc - m - ls).astype(o_ref.dtype)
        else:
            o_ref[...] = acc.astype(o_ref.dtype)


def _gcn_layer(a_p, x_p, w_p, b_p, *, tile_m, tile_k, activation, valid_cols,
               out_dtype):
    n_p = a_p.shape[0]
    cin_p = x_p.shape[1]
    f_p = w_p.shape[1]

    # Keep X fully resident in VMEM when it fits (constant-index BlockSpec ->
    # fetched once); otherwise stream the (tile_k, cin_p) source-row block.
    x_resident = (n_p * cin_p * 2) <= X_RESIDENT_BYTES
    if x_resident:
        x_spec = pl.BlockSpec((n_p, cin_p), lambda i, k: (0, 0))
    else:
        x_spec = pl.BlockSpec((tile_k, cin_p), lambda i, k: (k, 0))

    kernel = functools.partial(
        _gcn_layer_kernel, activation=activation, valid_cols=valid_cols,
        tile_k=tile_k, x_resident=x_resident)

    return pl.pallas_call(
        kernel,
        out_shape=jax.ShapeDtypeStruct((n_p, f_p), out_dtype),
        grid_spec=pltpu.PrefetchScalarGridSpec(
            num_scalar_prefetch=0,
            grid=(n_p // tile_m, n_p // tile_k),
            in_specs=[
                x_spec,                                               # X
                pl.BlockSpec((cin_p, f_p), lambda i, k: (0, 0)),      # W resident
                # A_hat is the only operand streamed every step.
                # (If profiles show exposed DMA at large tiles, sweep
                #  pipeline_mode=pl.Buffered(3) here.)
                pl.BlockSpec((tile_m, tile_k), lambda i, k: (i, k)),  # A_hat
                pl.BlockSpec((1, f_p), lambda i, k: (0, 0)),          # bias
            ],
            out_specs=pl.BlockSpec((tile_m, f_p), lambda i, k: (i, 0)),
            scratch_shapes=[pltpu.VMEM((tile_m, f_p), jnp.float32)],
        ),
        compiler_params=pltpu.CompilerParams(
            dimension_semantics=("parallel", "arbitrary"),
            vmem_limit_bytes=VMEM_LIMIT_BYTES,
        ),
    )(x_p, w_p, a_p, b_p)


# --------------------------- preparation + forward ---------------------------
def prepare_gcn_inputs(a_hat, w1, b1, w2, b2):
    """One-time pad + bf16 cast of the structural / weight constants (hoisted
    out of the per-forward path)."""
    n = a_hat.shape[0]
    cin, hid = w1.shape
    cout = w2.shape[1]
    tile_m, tile_k, n_p = _choose_tiles(n)
    cin_p = _round_up(cin, LANE)
    hid_p = _round_up(hid, LANE)
    cout_p = _round_up(cout, LANE)

    prep = dict(
        a=_pad2(a_hat, n_p, n_p).astype(jnp.bfloat16),
        w1=_pad2(w1, cin_p, hid_p).astype(jnp.bfloat16),
        w2=_pad2(w2, hid_p, cout_p).astype(jnp.bfloat16),
        b1=_pad2(b1, 1, hid_p).astype(jnp.float32),
        b2=_pad2(b2, 1, cout_p).astype(jnp.float32),
    )
    meta = dict(n=n, n_p=n_p, cin_p=cin_p, cout=cout,
                tile_m=tile_m, tile_k=tile_k)
    return prep, meta


def gcn_forward_prepared(x, a, w1, b1, w2, b2, *, n, n_p, cin_p, cout,
                         tile_m, tile_k):
    # Per-forward work: only the node features get padded / cast.
    x_p = _pad2(x, n_p, cin_p).astype(jnp.bfloat16)

    # Layer 1: fused X @ W1 -> A_hat aggregation -> +b1 -> ReLU
    h = _gcn_layer(a, x_p, w1, b1, tile_m=tile_m, tile_k=tile_k,
                   activation="relu", valid_cols=w1.shape[1],
                   out_dtype=jnp.bfloat16)

    # Dropout: eval mode -> identity.

    # Layer 2: fused H @ W2 -> A_hat aggregation -> +b2 -> log_softmax
    z = _gcn_layer(a, h, w2, b2, tile_m=tile_m, tile_k=tile_k,
                   activation="log_softmax", valid_cols=cout,
                   out_dtype=jnp.float32)

    return z[:n, :cout]


def gcn_forward(x, a_hat, w1, b1, w2, b2):
    prep, meta = prepare_gcn_inputs(a_hat, w1, b1, w2, b2)
    return gcn_forward_prepared(x, **prep, **meta)


# ------------------------------- glue (JAX) ----------------------------------
def gcn_norm_dense(edge_index, num_nodes):
    """Dense D^{-1/2}(A + I)D^{-1/2}, matching PyG GCNConv's gcn_norm."""
    src = edge_index[0]
    dst = edge_index[1]
    loops = jnp.arange(num_nodes, dtype=edge_index.dtype)
    src = jnp.concatenate([src, loops])
    dst = jnp.concatenate([dst, loops])
    w = jnp.ones(src.shape[0], jnp.float32)
    deg = jnp.zeros((num_nodes,), jnp.float32).at[dst].add(w)
    dinv = jnp.where(deg > 0, 1.0 / jnp.sqrt(deg), 0.0)
    norm = dinv[src] * dinv[dst]
    a = jnp.zeros((num_nodes, num_nodes), jnp.float32).at[dst, src].add(norm)
    return a


def init_params(key, in_channels, hidden_channels, out_channels):
    k1, k2 = jax.random.split(key)
    s1 = (6.0 / (in_channels + hidden_channels)) ** 0.5
    s2 = (6.0 / (hidden_channels + out_channels)) ** 0.5
    w1 = jax.random.uniform(k1, (in_channels, hidden_channels), jnp.float32, -s1, s1)
    w2 = jax.random.uniform(k2, (hidden_channels, out_channels), jnp.float32, -s2, s2)
    b1 = jnp.zeros((1, hidden_channels), jnp.float32)
    b2 = jnp.zeros((1, out_channels), jnp.float32)
    return w1, b1, w2, b2


def reference_forward(x, a_hat, w1, b1, w2, b2):
    """f32 reference of the module forward (eval mode), mirroring the bf16
    operand rounding the kernel applies so the check isolates kernel math."""
    bf = lambda t: t.astype(jnp.bfloat16).astype(jnp.float32)
    hi = jax.lax.Precision.HIGHEST
    a = bf(a_hat)
    xw1 = bf(jnp.dot(bf(x), bf(w1), precision=hi))
    h = jnp.maximum(jnp.dot(a, xw1, precision=hi) + b1, 0.0)
    xw2 = bf(jnp.dot(bf(h), bf(w2), precision=hi))
    z = jnp.dot(a, xw2, precision=hi) + b2
    return jax.nn.log_softmax(z, axis=1)


if __name__ == "__main__":
    # Small shapes consistent with the module (node classification graph).
    num_nodes = 200
    in_channels = 16
    hidden_channels = 32
    out_channels = 7
    dropout_rate = 0.5  # unused in eval-mode forward
    num_edges = 800

    key = jax.random.PRNGKey(0)
    kx, ke, kp = jax.random.split(key, 3)

    # data.x: [num_nodes, in_channels]
    x = jax.random.normal(kx, (num_nodes, in_channels), jnp.float32)
    # data.edge_index: [2, num_edges]
    edge_index = jax.random.randint(ke, (2, num_edges), 0, num_nodes, jnp.int32)

    a_hat = gcn_norm_dense(edge_index, num_nodes)
    w1, b1, w2, b2 = init_params(kp, in_channels, hidden_channels, out_channels)

    # One-time preparation (pad + bf16 cast of A_hat / weights), then a jitted
    # forward that only pads the node features per call.
    prep, meta = prepare_gcn_inputs(a_hat, w1, b1, w2, b2)
    fwd = jax.jit(functools.partial(gcn_forward_prepared, **meta))
    out = jax.block_until_ready(fwd(x, **prep))

    ref = reference_forward(x, a_hat, w1, b1, w2, b2)
    assert out.shape == (num_nodes, out_channels)
    err = float(jnp.max(jnp.abs(out - ref)))
    assert jnp.allclose(out, ref, atol=2e-2, rtol=2e-2), err

    print("KERNEL_OK")
</pallas_src>

<mosaic_0001>
module attributes {stable_mosaic.version = 11 : i64} {
  func.func @_gcn_layer_kernel(%arg0: i32, %arg1: i32, %arg2: memref<256x128xbf16, #tpu.memory_space<vmem>>, %arg3: memref<128x128xbf16, #tpu.memory_space<vmem>>, %arg4: memref<128x256xbf16, #tpu.memory_space<vmem>>, %arg5: memref<1x128xf32, #tpu.memory_space<vmem>>, %arg6: memref<128x128xbf16, #tpu.memory_space<vmem>>, %arg7: memref<128x128xf32, #tpu.memory_space<vmem>>) attributes {dimension_semantics = [#tpu.dimension_semantics<parallel>, #tpu.dimension_semantics<arbitrary>], iteration_bounds = array<i64: 2, 1>, scalar_prefetch = 0 : i64, scratch_operands = 1 : i64, tpu.core_type = #tpu.core_type<tc>, window_params = [{pipeline_mode = #tpu.pipeline_mode<synchronous>, transform_indices = @transform_0, window_bounds = array<i64: 256, 128>}, {pipeline_mode = #tpu.pipeline_mode<synchronous>, transform_indices = @transform_1, window_bounds = array<i64: 128, 128>}, {transform_indices = @transform_2, window_bounds = array<i64: 128, 256>}, {pipeline_mode = #tpu.pipeline_mode<synchronous>, transform_indices = @transform_3, window_bounds = array<i64: 1, 128>}, {transform_indices = @transform_4, window_bounds = array<i64: 128, 128>}]} {
    %c0_i32 = arith.constant 0 : i32
    %0 = arith.cmpi eq, %arg1, %c0_i32 : i32
    %1 = arith.extui %0 : i1 to i32
    %c0_i32_0 = arith.constant 0 : i32
    %2 = arith.cmpi ne, %1, %c0_i32_0 : i32
    scf.if %2 {
      %c0_12 = arith.constant 0 : index
      %c0_13 = arith.constant 0 : index
      %18 = vector.load %arg5[%c0_12, %c0_13] : memref<1x128xf32, #tpu.memory_space<vmem>>, vector<1x128xf32>
      %19 = vector.shape_cast %18 : vector<1x128xf32> to vector<1x128xf32>
      %20 = vector.broadcast %19 : vector<1x128xf32> to vector<128x128xf32>
      %c0_14 = arith.constant 0 : index
      %c0_15 = arith.constant 0 : index
      %21 = vector.load %arg7[%c0_14, %c0_15] : memref<128x128xf32, #tpu.memory_space<vmem>>, vector<128x128xf32>
      tpu.vector_store %arg7[%c0_14, %c0_15], %20 {strides = array<i32>} : memref<128x128xf32, #tpu.memory_space<vmem>>, vector<128x128xf32>,
    } else {
    }
    %c256_i32 = arith.constant 256 : i32
    %3 = arith.muli %arg1, %c256_i32 : i32
    %4 = tpu.assume_multiple %3, 256 : i32
    %5 = arith.index_cast %4 : i32 to index
    %c0 = arith.constant 0 : index
    %6 = vector.load %arg2[%5, %c0] : memref<256x128xbf16, #tpu.memory_space<vmem>>, vector<256x128xbf16>
    %c0_1 = arith.constant 0 : index
    %c0_2 = arith.constant 0 : index
    %7 = vector.load %arg3[%c0_1, %c0_2] : memref<128x128xbf16, #tpu.memory_space<vmem>>, vector<128x128xbf16>
    %cst = arith.constant dense<0.000000e+00> : vector<256x128xf32>
    %8 = tpu.matmul %6, %7, %cst {dimension_numbers = #tpu.dot_dimension_numbers<[1], [0], [0], [1], [0, 0, 1, 1], [], []>} : vector<256x128xbf16>, vector<128x128xbf16>, vector<256x128xf32> -> vector<256x128xf32>
    %9 = arith.truncf %8 : vector<256x128xf32> to vector<256x128xbf16>
    %c0_3 = arith.constant 0 : index
    %c0_4 = arith.constant 0 : index
    %10 = vector.load %arg7[%c0_3, %c0_4] : memref<128x128xf32, #tpu.memory_space<vmem>>, vector<128x128xf32>
    %c0_5 = arith.constant 0 : index
    %c0_6 = arith.constant 0 : index
    %11 = vector.load %arg4[%c0_5, %c0_6] : memref<128x256xbf16, #tpu.memory_space<vmem>>, vector<128x256xbf16>
    %cst_7 = arith.constant dense<0.000000e+00> : vector<128x128xf32>
    %12 = tpu.matmul %11, %9, %cst_7 {dimension_numbers = #tpu.dot_dimension_numbers<[1], [0], [0], [1], [0, 0, 1, 1], [], []>} : vector<128x256xbf16>, vector<256x128xbf16>, vector<128x128xf32> -> vector<128x128xf32>
    %13 = arith.addf %10, %12 : vector<128x128xf32>
    %c0_8 = arith.constant 0 : index
    %c0_9 = arith.constant 0 : index
    %14 = vector.load %arg7[%c0_8, %c0_9] : memref<128x128xf32, #tpu.memory_space<vmem>>, vector<128x128xf32>
    tpu.vector_store %arg7[%c0_8, %c0_9], %13 {strides = array<i32>} : memref<128x128xf32, #tpu.memory_space<vmem>>, vector<128x128xf32>,
    %c0_i32_10 = arith.constant 0 : i32
    %15 = arith.cmpi eq, %arg1, %c0_i32_10 : i32
    %16 = arith.extui %15 : i1 to i32
    %c0_i32_11 = arith.constant 0 : i32
    %17 = arith.cmpi ne, %16, %c0_i32_11 : i32
    scf.if %17 {
      %c0_12 = arith.constant 0 : index
      %c0_13 = arith.constant 0 : index
      %18 = vector.load %arg7[%c0_12, %c0_13] : memref<128x128xf32, #tpu.memory_space<vmem>>, vector<128x128xf32>
      %cst_14 = arith.constant 0.000000e+00 : f32
      %19 = vector.broadcast %cst_14 : f32 to vector<128x128xf32>
      %20 = arith.maximumf %18, %19 : vector<128x128xf32>
      %21 = arith.truncf %20 : vector<128x128xf32> to vector<128x128xbf16>
      %c0_15 = arith.constant 0 : index
      %c0_16 = arith.constant 0 : index
      %22 = vector.load %arg6[%c0_15, %c0_16] : memref<128x128xbf16, #tpu.memory_space<vmem>>, vector<128x128xbf16>
      tpu.vector_store %arg6[%c0_15, %c0_16], %21 {strides = array<i32>} : memref<128x128xbf16, #tpu.memory_space<vmem>>, vector<128x128xbf16>,
    } else {
    }
    return
  }
  func.func @transform_0(%arg0: i32, %arg1: i32) -> (i32, i32) {
    %c0_i32 = arith.constant 0 : i32
    %c0_i32_0 = arith.constant 0 : i32
    %c0_i32_1 = arith.constant 0 : i32
    return %c0_i32, %c0_i32_0 : i32, i32
  }
  func.func @transform_1(%arg0: i32, %arg1: i32) -> (i32, i32) {
    %c0_i32 = arith.constant 0 : i32
    %c0_i32_0 = arith.constant 0 : i32
    %c0_i32_1 = arith.constant 0 : i32
    return %c0_i32, %c0_i32_0 : i32, i32
  }
  func.func @transform_2(%arg0: i32, %arg1: i32) -> (i32, i32) {
    %c0_i32 = arith.constant 0 : i32
    return %arg0, %arg1 : i32, i32
  }
  func.func @transform_3(%arg0: i32, %arg1: i32) -> (i32, i32) {
    %c0_i32 = arith.constant 0 : i32
    %c0_i32_0 = arith.constant 0 : i32
    %c0_i32_1 = arith.constant 0 : i32
    return %c0_i32, %c0_i32_0 : i32, i32
  }
  func.func @transform_4(%arg0: i32, %arg1: i32) -> (i32, i32) {
    %c0_i32 = arith.constant 0 : i32
    %c0_i32_0 = arith.constant 0 : i32
    return %arg0, %c0_i32 : i32, i32
  }
}

module attributes {stable_mosaic.version = 11 : i64} {
  func.func @_gcn_layer_kernel(%arg0: i32, %arg1: i32, %arg2: memref<256x128xbf16, #tpu.memory_space<vmem>>, %arg3: memref<128x128xbf16, #tpu.memory_space<vmem>>, %arg4: memref<128x256xbf16, #tpu.memory_space<vmem>>, %arg5: memref<1x128xf32, #tpu.memory_space<vmem>>, %arg6: memref<128x128xf32, #tpu.memory_space<vmem>>, %arg7: memref<128x128xf32, #tpu.memory_space<vmem>>) attributes {dimension_semantics = [#tpu.dimension_semantics<parallel>, #tpu.dimension_semantics<arbitrary>], iteration_bounds = array<i64: 2, 1>, scalar_prefetch = 0 : i64, scratch_operands = 1 : i64, tpu.core_type = #tpu.core_type<tc>, window_params = [{pipeline_mode = #tpu.pipeline_mode<synchronous>, transform_indices = @transform_0, window_bounds = array<i64: 256, 128>}, {pipeline_mode = #tpu.pipeline_mode<synchronous>, transform_indices = @transform_1, window_bounds = array<i64: 128, 128>}, {transform_indices = @transform_2, window_bounds = array<i64: 128, 256>}, {pipeline_mode = #tpu.pipeline_mode<synchronous>, transform_indices = @transform_3, window_bounds = array<i64: 1, 128>}, {transform_indices = @transform_4, window_bounds = array<i64: 128, 128>}]} {
    %c0_i32 = arith.constant 0 : i32
    %0 = arith.cmpi eq, %arg1, %c0_i32 : i32
    %1 = arith.extui %0 : i1 to i32
    %c0_i32_0 = arith.constant 0 : i32
    %2 = arith.cmpi ne, %1, %c0_i32_0 : i32
    scf.if %2 {
      %c0_12 = arith.constant 0 : index
      %c0_13 = arith.constant 0 : index
      %18 = vector.load %arg5[%c0_12, %c0_13] : memref<1x128xf32, #tpu.memory_space<vmem>>, vector<1x128xf32>
      %19 = vector.shape_cast %18 : vector<1x128xf32> to vector<1x128xf32>
      %20 = vector.broadcast %19 : vector<1x128xf32> to vector<128x128xf32>
      %c0_14 = arith.constant 0 : index
      %c0_15 = arith.constant 0 : index
      %21 = vector.load %arg7[%c0_14, %c0_15] : memref<128x128xf32, #tpu.memory_space<vmem>>, vector<128x128xf32>
      tpu.vector_store %arg7[%c0_14, %c0_15], %20 {strides = array<i32>} : memref<128x128xf32, #tpu.memory_space<vmem>>, vector<128x128xf32>,
    } else {
    }
    %c256_i32 = arith.constant 256 : i32
    %3 = arith.muli %arg1, %c256_i32 : i32
    %4 = tpu.assume_multiple %3, 256 : i32
    %5 = arith.index_cast %4 : i32 to index
    %c0 = arith.constant 0 : index
    %6 = vector.load %arg2[%5, %c0] : memref<256x128xbf16, #tpu.memory_space<vmem>>, vector<256x128xbf16>
    %c0_1 = arith.constant 0 : index
    %c0_2 = arith.constant 0 : index
    %7 = vector.load %arg3[%c0_1, %c0_2] : memref<128x128xbf16, #tpu.memory_space<vmem>>, vector<128x128xbf16>
    %cst = arith.constant dense<0.000000e+00> : vector<256x128xf32>
    %8 = tpu.matmul %6, %7, %cst {dimension_numbers = #tpu.dot_dimension_numbers<[1], [0], [0], [1], [0, 0, 1, 1], [], []>} : vector<256x128xbf16>, vector<128x128xbf16>, vector<256x128xf32> -> vector<256x128xf32>
    %9 = arith.truncf %8 : vector<256x128xf32> to vector<256x128xbf16>
    %c0_3 = arith.constant 0 : index
    %c0_4 = arith.constant 0 : index
    %10 = vector.load %arg7[%c0_3, %c0_4] : memref<128x128xf32, #tpu.memory_space<vmem>>, vector<128x128xf32>
    %c0_5 = arith.constant 0 : index
    %c0_6 = arith.constant 0 : index
    %11 = vector.load %arg4[%c0_5, %c0_6] : memref<128x256xbf16, #tpu.memory_space<vmem>>, vector<128x256xbf16>
    %cst_7 = arith.constant dense<0.000000e+00> : vector<128x128xf32>
    %12 = tpu.matmul %11, %9, %cst_7 {dimension_numbers = #tpu.dot_dimension_numbers<[1], [0], [0], [1], [0, 0, 1, 1], [], []>} : vector<128x256xbf16>, vector<256x128xbf16>, vector<128x128xf32> -> vector<128x128xf32>
    %13 = arith.addf %10, %12 : vector<128x128xf32>
    %c0_8 = arith.constant 0 : index
    %c0_9 = arith.constant 0 : index
    %14 = vector.load %arg7[%c0_8, %c0_9] : memref<128x128xf32, #tpu.memory_space<vmem>>, vector<128x128xf32>
    tpu.vector_store %arg7[%c0_8, %c0_9], %13 {strides = array<i32>} : memref<128x128xf32, #tpu.memory_space<vmem>>, vector<128x128xf32>,
    %c0_i32_10 = arith.constant 0 : i32
    %15 = arith.cmpi eq, %arg1, %c0_i32_10 : i32
    %16 = arith.extui %15 : i1 to i32
    %c0_i32_11 = arith.constant 0 : i32
    %17 = arith.cmpi ne, %16, %c0_i32_11 : i32
    scf.if %17 {
      %c0_12 = arith.constant 0 : index
      %c0_13 = arith.constant 0 : index
      %18 = vector.load %arg7[%c0_12, %c0_13] : memref<128x128xf32, #tpu.memory_space<vmem>>, vector<128x128xf32>
      %19 = tpu.iota {dimensions = array<i32: 1>} : vector<128x128xi32>
      %c7_i32 = arith.constant 7 : i32
      %20 = vector.broadcast %c7_i32 : i32 to vector<128x128xi32>
      %21 = arith.cmpi slt, %19, %20 : vector<128x128xi32>
      %cst_14 = arith.constant 0xFF800000 : f32
      %22 = vector.broadcast %cst_14 : f32 to vector<128x128xf32>
      %23 = arith.select %21, %18, %22 : vector<128x128xi1>, vector<128x128xf32>
      %cst_15 = arith.constant dense<0xFF800000> : vector<128xf32>
      %24 = vector.multi_reduction <maximumf>, %23, %cst_15 [1] : vector<128x128xf32> to vector<128xf32>
      %25 = vector.shape_cast %24 : vector<128xf32> to vector<128x1xf32>
      %26 = vector.broadcast %25 : vector<128x1xf32> to vector<128x128xf32>
      %27 = arith.subf %23, %26 : vector<128x128xf32>
      %28 = math.exp %27 : vector<128x128xf32>
      %cst_16 = arith.constant dense<0.000000e+00> : vector<128xf32>
      %29 = vector.multi_reduction <add>, %28, %cst_16 [1] : vector<128x128xf32> to vector<128xf32>
      %30 = vector.shape_cast %29 : vector<128xf32> to vector<128x1xf32>
      %31 = math.log %30 : vector<128x1xf32>
      %32 = vector.broadcast %25 : vector<128x1xf32> to vector<128x128xf32>
      %33 = arith.subf %18, %32 : vector<128x128xf32>
      %34 = vector.broadcast %31 : vector<128x1xf32> to vector<128x128xf32>
      %35 = arith.subf %33, %34 : vector<128x128xf32>
      %c0_17 = arith.constant 0 : index
      %c0_18 = arith.constant 0 : index
      %36 = vector.load %arg6[%c0_17, %c0_18] : memref<128x128xf32, #tpu.memory_space<vmem>>, vector<128x128xf32>
      tpu.vector_store %arg6[%c0_17, %c0_18], %35 {strides = array<i32>} : memref<128x128xf32, #tpu.memory_space<vmem>>, vector<128x128xf32>,
    } else {
    }
    return
  }
  func.func @transform_0(%arg0: i32, %arg1: i32) -> (i32, i32) {
    %c0_i32 = arith.constant 0 : i32
    %c0_i32_0 = arith.constant 0 : i32
    %c0_i32_1 = arith.constant 0 : i32
    return %c0_i32, %c0_i32_0 : i32, i32
  }
  func.func @transform_1(%arg0: i32, %arg1: i32) -> (i32, i32) {
    %c0_i32 = arith.constant 0 : i32
    %c0_i32_0 = arith.constant 0 : i32
    %c0_i32_1 = arith.constant 0 : i32
    return %c0_i32, %c0_i32_0 : i32, i32
  }
  func.func @transform_2(%arg0: i32, %arg1: i32) -> (i32, i32) {
    %c0_i32 = arith.constant 0 : i32
    return %arg0, %arg1 : i32, i32
  }
  func.func @transform_3(%arg0: i32, %arg1: i32) -> (i32, i32) {
    %c0_i32 = arith.constant 0 : i32
    %c0_i32_0 = arith.constant 0 : i32
    %c0_i32_1 = arith.constant 0 : i32
    return %c0_i32, %c0_i32_0 : i32, i32
  }
  func.func @transform_4(%arg0: i32, %arg1: i32) -> (i32, i32) {
    %c0_i32 = arith.constant 0 : i32
    %c0_i32_0 = arith.constant 0 : i32
    return %arg0, %c0_i32 : i32, i32
  }
}

</mosaic_0001>

<bundles_post_ra>
// kernel: gcn_forward_prepared.2
= control target key start
LH: loop header
LB: loop body
LE: loop exit
PB: predicated region body
PF: predicated region fallthrough
CT: control target
= control target key end

     0   :  { %s1453_s15 = smov 0   ;;  %s1455_s16 = smov 0   ;;  %s1614_s0 = inlined_call_operand.vmem [shape: bf16[256,128], index: 0, kind: input, shape index: {}]   ;;  %s1615_s1 = inlined_call_operand.vmem [shape: bf16[128,128], index: 1, kind: input, shape index: {}]   ;;  %s1616_s2 = inlined_call_operand.vmem [shape: bf16[256,256], index: 2, kind: input, shape index: {}]   ;;  %s1617_s3 = inlined_call_operand.vmem [shape: f32[1,128], index: 3, kind: input, shape index: {}]   ;;  %s1618_s4 = inlined_call_operand.vmem [shape: bf16[256,128], index: 4, kind: output, shape index: {}]  }
   0x1   :  { %s1457_s17 = smov 0  }
   0x2 LB: > { %s26_s18 = sadd.s32 1, %s1422_s16  ;;  %p1067_p0 = scmp.ge.s32.totalorder %s1426_s17, 1  ;;  %s1426_s17 = sphi %s1457_s17, %s14_s17   ;;  %s1422_s16 = sphi %s1455_s16, %s1620_s16   ;;  %s1418_s15 = sphi %s1453_s15, %s1619_s15  }
   0x3   : > { %p28_p1 = scmp.ge.s32.totalorder %s26_s18, 2  ;;  %p183_p2 = scmp.lt.s32.totalorder %s1426_s17, 3 }
   0x5   : > { %s1622_s18 = smov (%p28_p1, %s26_s18), 0  ;;  %p184_p3 = pnand %p1067_p0, %p183_p2 }
   0x6   : > { %v1356_v0 = vld [vmem:[%s1615_s1] sm:$0xff] (!%p184_p3)   ;;  %v1357_v1 = vld [vmem:[%s1615_s1 + $0x8] sm:$0xff] (!%p184_p3)   ;;  %v1358_v2 = vld [vmem:[%s1615_s1 + $0x10] sm:$0xff] (!%p184_p3)   ;;  %s1068_s23 = sshll.u32 (!%p184_p3), %s1418_s15, 4 }
   0x7   : > { %187 = sbr.rel (%p184_p3) target bundleno = 600 (0x258), region = 36  ;;  %1284 = vmatprep.subr.bf16.mxu0 (!%p184_p3), %v1356_v0  ;;  %v1359_v3 = vld [vmem:[%s1615_s1 + $0x18] sm:$0xff] (!%p184_p3)   ;;  %v1364_v4 = vld [vmem:[%s1614_s0] sm:$0xff] (!%p184_p3)   ;;  %v1361_v6 = vld [vmem:[%s1615_s1 + $0x28] sm:$0xff] (!%p184_p3)   ;;  %p216_p4 = scmp.lt.s32.totalorder (!%p184_p3), %s1068_s23, 31 }
   0x8   : > { %1285 = vmatpush3.bf16.msra.mxu0 (!%p184_p3), %v1356_v0  ;;  %1300 = vmatprep.mubr.bf16.mxu0 (!%p184_p3), %v1364_v4  ;;  %v1360_v5 = vld [vmem:[%s1615_s1 + $0x20] sm:$0xff] (!%p184_p3)   ;;  %v1362_v7 = vld [vmem:[%s1615_s1 + $0x30] sm:$0xff] (!%p184_p3)   ;;  %v1363_v8 = vld [vmem:[%s1615_s1 + $0x38] sm:$0xff] (!%p184_p3)  }
   0x9   : > { %1286 = vmatprep.subr.bf16.mxu0 (!%p184_p3), %v1357_v1  ;;  %v1365_v9 = vld [vmem:[%s1614_s0 + $0x8] sm:$0xff] (!%p184_p3)   ;;  %v1366_v10 = vld [vmem:[%s1614_s0 + $0x10] sm:$0xff] (!%p184_p3)   ;;  %v1367_v11 = vld [vmem:[%s1614_s0 + $0x18] sm:$0xff] (!%p184_p3)  }
   0xa   : > { %v1368_v12 = vld [vmem:[%s1614_s0 + $0x20] sm:$0xff] (!%p184_p3)   ;;  %v1369_v13 = vld [vmem:[%s1614_s0 + $0x28] sm:$0xff] (!%p184_p3)   ;;  %v1370_v14 = vld [vmem:[%s1614_s0 + $0x30] sm:$0xff] (!%p184_p3)  }
   0xb   : > { %v1371_v15 = vld [vmem:[%s1614_s0 + $0x38] sm:$0xff] (!%p184_p3)   ;;  %v1372_v16 = vld [vmem:[%s1614_s0 + $0x40] sm:$0xff] (!%p184_p3)   ;;  %v1373_v17 = vld [vmem:[%s1614_s0 + $0x48] sm:$0xff] (!%p184_p3)  }
   0xc   : > { %1287 = vmatpush3.bf16.msra.mxu0 (!%p184_p3), %v1357_v1  ;;  %v1374_v18 = vld [vmem:[%s1614_s0 + $0x50] sm:$0xff] (!%p184_p3)   ;;  %v1375_v19 = vld [vmem:[%s1614_s0 + $0x58] sm:$0xff] (!%p184_p3)   ;;  %v1376_v20 = vld [vmem:[%s1614_s0 + $0x60] sm:$0xff] (!%p184_p3)  }
   0xd   : > { %1288 = vmatprep.subr.bf16.mxu0 (!%p184_p3), %v1358_v2  ;;  %v1377_v21 = vld [vmem:[%s1614_s0 + $0x68] sm:$0xff] (!%p184_p3)   ;;  %v1378_v22 = vld [vmem:[%s1614_s0 + $0x70] sm:$0xff] (!%p184_p3)   ;;  %v1379_v23 = vld [vmem:[%s1614_s0 + $0x78] sm:$0xff] (!%p184_p3)  }
   0xe   : > { %s1624_s23 = smov (!%p216_p4, %s1068_s23), 31 }
   0xf   : > { %s1132_s24 = sshll.u32 %s1624_s23, 3  ;;  %s1072_s29 = sshll.u32 %s1624_s23, 2 }
  0x10   : > { %1289 = vmatpush3.bf16.msra.mxu0 %v1358_v2  ;;  %s1552_s27 = scalar_lea.vmem %s1616_s2, %s1132_s24  ;;  %s1581_s6 = scalar_lea.vmem %s1618_s4, %s1072_s29 }
  0x11   : > { %1290 = vmatprep.subr.bf16.mxu0 %v1359_v3  ;;  %v1382_v24 = vld [vmem:[%s1552_s27 + $0x4] ss:$8 sps:$4 sm:$0xff]  }
  0x12   : > { %778 = vmatprep.mubr.bf16.mxu1 %v1382_v24 }
  0x14   : > { %1291 = vmatpush3.bf16.msra.mxu0 %v1359_v3 }
  0x15   : > { %1292 = vmatprep.subr.bf16.mxu0 %v1360_v5 }
  0x18   : > { %1293 = vmatpush3.bf16.msra.mxu0 %v1360_v5 }
  0x19   : > { %1294 = vmatprep.subr.bf16.mxu0 %v1361_v6 }
  0x1c   : > { %1295 = vmatpush3.bf16.msra.mxu0 %v1361_v6 }
  0x1d   : > { %1296 = vmatprep.subr.bf16.mxu0 %v1362_v7 }
  0x20   : > { %1297 = vmatpush3.bf16.msra.mxu0 %v1362_v7 }
  0x21   : > { %1298 = vmatprep.subr.bf16.mxu0 %v1363_v8 }
  0x24   : > { %1299 = vmatpush3.bf16.msra.mxu0 %v1363_v8 }
  0x27   : > { %1301 = vmatmul.mubr.bf16.vlgmr.msra.gmra.mrb[0].mxu0 %v1365_v9  ;;  %v1380_v9 = vld [vmem:[%s1552_s27] ss:$8 sps:$4 sm:$0xff]  }
  0x28   : > { %1304 = vmatprep.mubr.bf16.mxu0 %v1366_v10  ;;  %v1383_v10 = vld [vmem:[%s1552_s27 + $0x14] ss:$8 sps:$4 sm:$0xff]  }
  0x2f   : > { %1305 = vmatmul.mubr.bf16.gmra.mrb[4].mxu0 %v1367_v11  ;;  %v1385_v11 = vld [vmem:[%s1552_s27 + $0x10] ss:$8 sps:$4 sm:$0xff]  }
  0x30   : > { %1308 = vmatprep.mubr.bf16.mxu0 %v1368_v12  ;;  %v1386_v12 = vld [vmem:[%s1552_s27 + $0x24] ss:$8 sps:$4 sm:$0xff]  }
  0x37   : > { %1309 = vmatmul.mubr.bf16.gmra.mrb[8].mxu0 %v1369_v13  ;;  %v1388_v13 = vld [vmem:[%s1552_s27 + $0x20] ss:$8 sps:$4 sm:$0xff]  }
  0x38   : > { %1312 = vmatprep.mubr.bf16.mxu0 %v1370_v14  ;;  %v1389_v14 = vld [vmem:[%s1552_s27 + $0x34] ss:$8 sps:$4 sm:$0xff]  }
  0x3f   : > { %1313 = vmatmul.mubr.bf16.gmra.mrb[12].mxu0 %v1371_v15  ;;  %v1391_v15 = vld [vmem:[%s1552_s27 + $0x30] ss:$8 sps:$4 sm:$0xff]  }
  0x40   : > { %1316 = vmatprep.mubr.bf16.mxu0 %v1372_v16  ;;  %v1392_v16 = vld [vmem:[%s1552_s27 + $0x44] ss:$8 sps:$4 sm:$0xff]  }
  0x47   : > { %1317 = vmatmul.mubr.bf16.gmra.mrb[16].mxu0 %v1373_v17  ;;  %v1394_v17 = vld [vmem:[%s1552_s27 + $0x40] ss:$8 sps:$4 sm:$0xff]  }
  0x48   : > { %1320 = vmatprep.mubr.bf16.mxu0 %v1374_v18  ;;  %v1395_v18 = vld [vmem:[%s1552_s27 + $0x54] ss:$8 sps:$4 sm:$0xff]  }
  0x4f   : > { %1321 = vmatmul.mubr.bf16.gmra.mrb[20].mxu0 %v1375_v19  ;;  %v1397_v19 = vld [vmem:[%s1552_s27 + $0x50] ss:$8 sps:$4 sm:$0xff]  }
  0x50   : > { %1324 = vmatprep.mubr.bf16.mxu0 %v1376_v20  ;;  %v1398_v20 = vld [vmem:[%s1552_s27 + $0x64] ss:$8 sps:$4 sm:$0xff]  }
  0x57   : > { %1325 = vmatmul.mubr.bf16.gmra.mrb[24].mxu0 %v1377_v21  ;;  %v1400_v21 = vld [vmem:[%s1552_s27 + $0x60] ss:$8 sps:$4 sm:$0xff]  }
  0x58   : > { %1328 = vmatprep.mubr.bf16.mxu0 %v1378_v22  ;;  %v1401_v22 = vld [vmem:[%s1552_s27 + $0x74] ss:$8 sps:$4 sm:$0xff]  }
  0x5f   : > { %1329 = vmatmul.mubr.bf16.gmra.mrb[28].mxu0 %v1379_v23  ;;  %v1403_v23 = vld [vmem:[%s1552_s27 + $0x70] ss:$8 sps:$4 sm:$0xff]  }
  0xfa   : > { %v1302_v25 = vpop.f32.mrb[0].mxu0 }
  0xfb   : > { %v491_v26 = vpop.f32.mrb[1].mxu0 }
  0xfc   : > { %v1303_v27 = vpop.f32.mrb[2].mxu0 }
  0xfd   : > { %v619_v28 = vpack.c.bf16 %v1303_v27, %v1302_v25  ;;  %v494_v29 = vpop.f32.mrb[3].mxu0  ;;  %v1573_v25 = vld [vmem:[%s1617_s3] ss:$0 sm:$0xff] }
  0xfe   : > { %v618_v30 = vpack.c.bf16 %v494_v29, %v491_v26 }
 0x102   : > { %v1306_v31 = vpop.f32.mrb[4].mxu0 }
 0x103   : > { %v507_v32 = vpop.f32.mrb[5].mxu0 }
 0x104   : > { %v1307_v33 = vpop.f32.mrb[6].mxu0 }
 0x105   : > { %v621_v34 = vpack.c.bf16 %v1307_v33, %v1306_v31  ;;  %v510_v35 = vpop.f32.mrb[7].mxu0 }
 0x106   : > { %v620_v36 = vpack.c.bf16 %v510_v35, %v507_v32 }
 0x10a   : > { %v1310_v37 = vpop.f32.mrb[8].mxu0 }
 0x10b   : > { %v523_v38 = vpop.f32.mrb[9].mxu0 }
 0x10c   : > { %v1311_v39 = vpop.f32.mrb[10].mxu0 }
 0x10d   : > { %v623_v40 = vpack.c.bf16 %v1311_v39, %v1310_v37  ;;  %v526_v41 = vpop.f32.mrb[11].mxu0 }
 0x10e   : > { %v622_v42 = vpack.c.bf16 %v526_v41, %v523_v38 }
 0x112   : > { %v1314_v43 = vpop.f32.mrb[12].mxu0 }
 0x113   : > { %v539_v44 = vpop.f32.mrb[13].mxu0 }
 0x114   : > { %v1315_v45 = vpop.f32.mrb[14].mxu0 }
 0x115   : > { %v625_v46 = vpack.c.bf16 %v1315_v45, %v1314_v43  ;;  %v542_v47 = vpop.f32.mrb[15].mxu0 }
 0x116   : > { %v624_v48 = vpack.c.bf16 %v542_v47, %v539_v44 }
 0x11a   : > { %v1318_v49 = vpop.f32.mrb[16].mxu0 }
 0x11b   : > { %v555_v50 = vpop.f32.mrb[17].mxu0 }
 0x11c   : > { %v1319_v51 = vpop.f32.mrb[18].mxu0 }
 0x11d   : > { %v627_v52 = vpack.c.bf16 %v1319_v51, %v1318_v49  ;;  %v558_v53 = vpop.f32.mrb[19].mxu0 }
 0x11e   : > { %v626_v54 = vpack.c.bf16 %v558_v53, %v555_v50 }
 0x120   : > { %1220 = vmatprep.subr.bf16.mxu1 %v626_v54 }
 0x121   : > { %1221 = vmatpush3.bf16.msra.mxu1 %v618_v30 }
 0x122   : > { %v1322_v55 = vpop.f32.mrb[20].mxu0  ;;  %1222 = vmatprep.subr.bf16.mxu1 %v627_v52 }
 0x123   : > { %v571_v56 = vpop.f32.mrb[21].mxu0 }
 0x124   : > { %v1323_v57 = vpop.f32.mrb[22].mxu0 }
 0x125   : > { %v629_v58 = vpack.c.bf16 %v1323_v57, %v1322_v55  ;;  %v574_v59 = vpop.f32.mrb[23].mxu0  ;;  %1223 = vmatpush3.bf16.msra.mxu1 %v619_v28 }
 0x126   : > { %v628_v60 = vpack.c.bf16 %v574_v59, %v571_v56 }
 0x128   : > { %1224 = vmatprep.subr.bf16.mxu1 %v628_v60 }
 0x129   : > { %1225 = vmatpush3.bf16.msra.mxu1 %v620_v36 }
 0x12a   : > { %v1326_v61 = vpop.f32.mrb[24].mxu0  ;;  %1226 = vmatprep.subr.bf16.mxu1 %v629_v58 }
 0x12b   : > { %v587_v62 = vpop.f32.mrb[25].mxu0 }
 0x12c   : > { %v1327_v63 = vpop.f32.mrb[26].mxu0 }
 0x12d   : > { %v631_v0 = vpack.c.bf16 %v1327_v63, %v1326_v61  ;;  %v590_v1 = vpop.f32.mrb[27].mxu0  ;;  %1227 = vmatpush3.bf16.msra.mxu1 %v621_v34 }
 0x12e   : > { %v630_v2 = vpack.c.bf16 %v590_v1, %v587_v62 }
 0x130   : > { %1228 = vmatprep.subr.bf16.mxu1 %v630_v2 }
 0x131   : > { %1229 = vmatpush3.bf16.msra.mxu1 %v622_v42 }
 0x132   : > { %v1330_v3 = vpop.f32.mrb[28].mxu0  ;;  %1230 = vmatprep.subr.bf16.mxu1 %v631_v0 }
 0x133   : > { %v603_v4 = vpop.f32.mrb[29].mxu0 }
 0x134   : > { %v1331_v5 = vpop.f32.mrb[30].mxu0 }
 0x135   : > { %v633_v6 = vpack.c.bf16 %v1331_v5, %v1330_v3  ;;  %v606_v7 = vpop.f32.mrb[31].mxu0  ;;  %1231 = vmatpush3.bf16.msra.mxu1 %v623_v40 }
 0x136   : > { %v632_v8 = vpack.c.bf16 %v606_v7, %v603_v4 }
 0x138   : > { %1232 = vmatprep.subr.bf16.mxu1 %v632_v8 }
 0x139   : > { %1233 = vmatpush3.bf16.msra.mxu1 %v624_v48 }
 0x13a   : > { %1234 = vmatprep.subr.bf16.mxu1 %v633_v6 }
 0x13d   : > { %1235 = vmatpush3.bf16.msra.mxu1 %v625_v46 }
 0x140   : > { %779 = vmatmul.mubr.bf16.vlgmr.msra.gmra.mrb[0].mxu1 %v1380_v9 }
 0x141   : > { %786 = vmatprep.mubr.bf16.mxu1 %v1383_v10 }
 0x148   : > { %787 = vmatmul.mubr.bf16.gmra.mrb[4].mxu1 %v1385_v11 }
 0x149   : > { %794 = vmatprep.mubr.bf16.mxu1 %v1386_v12 }
 0x150   : > { %795 = vmatmul.mubr.bf16.gmra.mrb[8].mxu1 %v1388_v13 }
 0x151   : > { %802 = vmatprep.mubr.bf16.mxu1 %v1389_v14 }
 0x158   : > { %803 = vmatmul.mubr.bf16.gmra.mrb[12].mxu1 %v1391_v15 }
 0x159   : > { %810 = vmatprep.mubr.bf16.mxu1 %v1392_v16 }
 0x160   : > { %811 = vmatmul.mubr.bf16.gmra.mrb[16].mxu1 %v1394_v17 }
 0x161   : > { %818 = vmatprep.mubr.bf16.mxu1 %v1395_v18 }
 0x168   : > { %819 = vmatmul.mubr.bf16.gmra.mrb[20].mxu1 %v1397_v19 }
 0x169   : > { %826 = vmatprep.mubr.bf16.mxu1 %v1398_v20 }
 0x170   : > { %827 = vmatmul.mubr.bf16.gmra.mrb[24].mxu1 %v1400_v21 }
 0x171   : > { %834 = vmatprep.mubr.bf16.mxu1 %v1401_v22 }
 0x178   : > { %835 = vmatmul.mubr.bf16.gmra.mrb[28].mxu1 %v1403_v23 }
 0x213   : > { %v1236_v24 = vpop.f32.mrb[0].mxu1 }
 0x214   : > { %v1237_v26 = vpop.f32.mrb[1].mxu1 }
 0x215   : > { %v1238_v27 = vadd.f32 %v1237_v26, %v1236_v24  ;;  %v1239_v28 = vpop.f32.mrb[2].mxu1 }
 0x216   : > { %v1240_v29 = vpop.f32.mrb[3].mxu1 }
 0x217   : > { %v843_v30 = vadd.f32 %v1238_v27, %v1573_v25  ;;  %v1241_v31 = vadd.f32 %v1240_v29, %v1239_v28 }
 0x219   : > { %v844_v32 = vadd.f32 %v1241_v31, %v1573_v25  ;;  %v894_v33 = vmax.f32 %v843_v30, 0.0 }
 0x21b   : > { %v895_v34 = vmax.f32 %v844_v32, 0.0  ;;  %v1242_v35 = vpop.f32.mrb[4].mxu1 }
 0x21c   : > { %v1243_v36 = vpop.f32.mrb[5].mxu1 }
 0x21d   : > { %v1152_v37 = vpack.c.bf16 %v895_v34, %v894_v33  ;;  %v1244_v38 = vadd.f32 %v1243_v36, %v1242_v35  ;;  %v1245_v39 = vpop.f32.mrb[6].mxu1 }
 0x21e   : > { %v1246_v40 = vpop.f32.mrb[7].mxu1 }
 0x21f   : > { %1153 = vst [vmem:[%s1581_s6] sm:$0xff] %v1152_v37   ;;  %v845_v41 = vadd.f32 %v1244_v38, %v1573_v25  ;;  %v1247_v42 = vadd.f32 %v1246_v40, %v1245_v39 }
 0x221   : > { %v846_v43 = vadd.f32 %v1247_v42, %v1573_v25  ;;  %v896_v44 = vmax.f32 %v845_v41, 0.0 }
 0x223   : > { %v897_v45 = vmax.f32 %v846_v43, 0.0  ;;  %v1248_v46 = vpop.f32.mrb[8].mxu1 }
 0x224   : > { %v1249_v47 = vpop.f32.mrb[9].mxu1 }
 0x225   : > { %v1157_v48 = vpack.c.bf16 %v897_v45, %v896_v44  ;;  %v1250_v49 = vadd.f32 %v1249_v47, %v1248_v46  ;;  %v1251_v50 = vpop.f32.mrb[10].mxu1 }
 0x226   : > { %v1252_v51 = vpop.f32.mrb[11].mxu1 }
 0x227   : > { %1189 = vst [vmem:[%s1581_s6 + $0x8] sm:$0xff] %v1157_v48   ;;  %v847_v52 = vadd.f32 %v1250_v49, %v1573_v25  ;;  %v1253_v53 = vadd.f32 %v1252_v51, %v1251_v50 }
 0x229   : > { %v848_v54 = vadd.f32 %v1253_v53, %v1573_v25  ;;  %v898_v55 = vmax.f32 %v847_v52, 0.0 }
 0x22b   : > { %v899_v56 = vmax.f32 %v848_v54, 0.0  ;;  %v1254_v57 = vpop.f32.mrb[12].mxu1 }
 0x22c   : > { %v1255_v58 = vpop.f32.mrb[13].mxu1 }
 0x22d   : > { %v1162_v59 = vpack.c.bf16 %v899_v56, %v898_v55  ;;  %v1256_v60 = vadd.f32 %v1255_v58, %v1254_v57  ;;  %v1257_v61 = vpop.f32.mrb[14].mxu1 }
 0x22e   : > { %v1258_v62 = vpop.f32.mrb[15].mxu1 }
 0x22f   : > { %1190 = vst [vmem:[%s1581_s6 + $0x10] sm:$0xff] %v1162_v59   ;;  %v849_v63 = vadd.f32 %v1256_v60, %v1573_v25  ;;  %v1259_v0 = vadd.f32 %v1258_v62, %v1257_v61 }
 0x231   : > { %v850_v1 = vadd.f32 %v1259_v0, %v1573_v25  ;;  %v900_v2 = vmax.f32 %v849_v63, 0.0 }
 0x233   : > { %v901_v3 = vmax.f32 %v850_v1, 0.0  ;;  %v1260_v4 = vpop.f32.mrb[16].mxu1 }
 0x234   : > { %v1261_v5 = vpop.f32.mrb[17].mxu1 }
 0x235   : > { %v1167_v6 = vpack.c.bf16 %v901_v3, %v900_v2  ;;  %v1262_v7 = vadd.f32 %v1261_v5, %v1260_v4  ;;  %v1263_v8 = vpop.f32.mrb[18].mxu1 }
 0x236   : > { %v1264_v9 = vpop.f32.mrb[19].mxu1 }
 0x237   : > { %1191 = vst [vmem:[%s1581_s6 + $0x18] sm:$0xff] %v1167_v6   ;;  %v851_v10 = vadd.f32 %v1262_v7, %v1573_v25  ;;  %v1265_v11 = vadd.f32 %v1264_v9, %v1263_v8 }
 0x239   : > { %v852_v12 = vadd.f32 %v1265_v11, %v1573_v25  ;;  %v902_v13 = vmax.f32 %v851_v10, 0.0 }
 0x23b   : > { %v903_v14 = vmax.f32 %v852_v12, 0.0  ;;  %v1266_v15 = vpop.f32.mrb[20].mxu1 }
 0x23c   : > { %v1267_v16 = vpop.f32.mrb[21].mxu1 }
 0x23d   : > { %v1172_v17 = vpack.c.bf16 %v903_v14, %v902_v13  ;;  %v1268_v18 = vadd.f32 %v1267_v16, %v1266_v15  ;;  %v1269_v19 = vpop.f32.mrb[22].mxu1 }
 0x23e   : > { %v1270_v20 = vpop.f32.mrb[23].mxu1 }
 0x23f   : > { %1192 = vst [vmem:[%s1581_s6 + $0x20] sm:$0xff] %v1172_v17   ;;  %v853_v21 = vadd.f32 %v1268_v18, %v1573_v25  ;;  %v1271_v22 = vadd.f32 %v1270_v20, %v1269_v19 }
 0x241   : > { %v854_v23 = vadd.f32 %v1271_v22, %v1573_v25  ;;  %v904_v24 = vmax.f32 %v853_v21, 0.0 }
 0x243   : > { %v905_v26 = vmax.f32 %v854_v23, 0.0  ;;  %v1272_v27 = vpop.f32.mrb[24].mxu1 }
 0x244   : > { %v1273_v28 = vpop.f32.mrb[25].mxu1 }
 0x245   : > { %v1177_v29 = vpack.c.bf16 %v905_v26, %v904_v24  ;;  %v1274_v30 = vadd.f32 %v1273_v28, %v1272_v27  ;;  %v1275_v31 = vpop.f32.mrb[26].mxu1 }
 0x246   : > { %v1276_v32 = vpop.f32.mrb[27].mxu1 }
 0x247   : > { %1193 = vst [vmem:[%s1581_s6 + $0x28] sm:$0xff] %v1177_v29   ;;  %v855_v33 = vadd.f32 %v1274_v30, %v1573_v25  ;;  %v1277_v34 = vadd.f32 %v1276_v32, %v1275_v31 }
 0x249   : > { %v856_v35 = vadd.f32 %v1277_v34, %v1573_v25  ;;  %v906_v36 = vmax.f32 %v855_v33, 0.0 }
 0x24b   : > { %v907_v37 = vmax.f32 %v856_v35, 0.0  ;;  %v1278_v38 = vpop.f32.mrb[28].mxu1 }
 0x24c   : > { %v1279_v39 = vpop.f32.mrb[29].mxu1 }
 0x24d   : > { %v1182_v40 = vpack.c.bf16 %v907_v37, %v906_v36  ;;  %v1280_v41 = vadd.f32 %v1279_v39, %v1278_v38  ;;  %v1281_v42 = vpop.f32.mrb[30].mxu1 }
 0x24e   : > { %v1282_v43 = vpop.f32.mrb[31].mxu1 }
 0x24f   : > { %1194 = vst [vmem:[%s1581_s6 + $0x30] sm:$0xff] %v1182_v40   ;;  %v857_v44 = vadd.f32 %v1280_v41, %v1573_v25  ;;  %v1283_v45 = vadd.f32 %v1282_v43, %v1281_v42 }
 0x251   : > { %v858_v46 = vadd.f32 %v1283_v45, %v1573_v25  ;;  %v908_v47 = vmax.f32 %v857_v44, 0.0 }
 0x253   : > { %v909_v48 = vmax.f32 %v858_v46, 0.0 }
 0x255   : > { %v1187_v49 = vpack.c.bf16 %v909_v48, %v908_v47 }
 0x257   : > { %1195 = vst [vmem:[%s1581_s6 + $0x38] sm:$0xff] %v1187_v49  }
 0x258 PF: > { %s14_s17 = sadd.s32 1, %s1426_s17   ;;  %s1619_s15 = smov %s1422_s16 }
 0x259   : > { %p11_p5 = scmp.ge.s32.totalorder %s14_s17, 4   ;;  %s1620_s16 = smov %s1622_s18 }
 0x25b   :  { %13 = sbr.rel (!%p11_p5) target bundleno = 2 (0x2), region = 75 }

// kernel: gcn_forward_prepared.3
= control target key start
LH: loop header
LB: loop body
LE: loop exit
PB: predicated region body
PF: predicated region fallthrough
CT: control target
= control target key end

     0   :  { %s1553_s15 = smov 0   ;;  %s1555_s16 = smov 0   ;;  %s1952_s0 = inlined_call_operand.vmem [shape: bf16[256,128], index: 0, kind: input, shape index: {}]   ;;  %s1953_s1 = inlined_call_operand.vmem [shape: bf16[128,128], index: 1, kind: input, shape index: {}]   ;;  %s1954_s2 = inlined_call_operand.vmem [shape: bf16[256,256], index: 2, kind: input, shape index: {}]   ;;  %s1955_s3 = inlined_call_operand.vmem [shape: f32[1,128], index: 3, kind: input, shape index: {}]   ;;  %s1956_s4 = inlined_call_operand.vmem [shape: f32[256,128], index: 4, kind: output, shape index: {}]  }
   0x1   :  { %s1557_s17 = smov 0  }
   0x2 LB: > { %s26_s18 = sadd.s32 1, %s1522_s16  ;;  %p1182_p0 = scmp.ge.s32.totalorder %s1526_s17, 1  ;;  %s1526_s17 = sphi %s1557_s17, %s14_s17   ;;  %s1522_s16 = sphi %s1555_s16, %s1958_s16   ;;  %s1518_s15 = sphi %s1553_s15, %s1957_s15  }
   0x3   : > { %p28_p1 = scmp.ge.s32.totalorder %s26_s18, 2  ;;  %p183_p2 = scmp.lt.s32.totalorder %s1526_s17, 3 }
   0x5   : > { %s1960_s18 = smov (%p28_p1, %s26_s18), 0  ;;  %p184_p3 = pnand %p1182_p0, %p183_p2 }
   0x6   : > { %v1392_v0 = vld [vmem:[%s1953_s1] sm:$0xff] (!%p184_p3)   ;;  %v1393_v1 = vld [vmem:[%s1953_s1 + $0x8] sm:$0xff] (!%p184_p3)   ;;  %v1394_v2 = vld [vmem:[%s1953_s1 + $0x10] sm:$0xff] (!%p184_p3)   ;;  %s1183_s23 = sshll.u32 (!%p184_p3), %s1518_s15, 4 }
   0x7   : > { %187 = sbr.rel (%p184_p3) target bundleno = 911 (0x38f), region = 36  ;;  %1320 = vmatprep.subr.bf16.mxu0 (!%p184_p3), %v1392_v0  ;;  %v1395_v3 = vld [vmem:[%s1953_s1 + $0x18] sm:$0xff] (!%p184_p3)   ;;  %v1400_v4 = vld [vmem:[%s1952_s0] sm:$0xff] (!%p184_p3)   ;;  %v1397_v6 = vld [vmem:[%s1953_s1 + $0x28] sm:$0xff] (!%p184_p3)   ;;  %p216_p4 = scmp.lt.s32.totalorder (!%p184_p3), %s1183_s23, 31 }
   0x8   : > { %1321 = vmatpush3.bf16.msra.mxu0 (!%p184_p3), %v1392_v0  ;;  %1336 = vmatprep.mubr.bf16.mxu0 (!%p184_p3), %v1400_v4  ;;  %v1396_v5 = vld [vmem:[%s1953_s1 + $0x20] sm:$0xff] (!%p184_p3)   ;;  %v1398_v7 = vld [vmem:[%s1953_s1 + $0x30] sm:$0xff] (!%p184_p3)   ;;  %v1399_v8 = vld [vmem:[%s1953_s1 + $0x38] sm:$0xff] (!%p184_p3)  }
   0x9   : > { %1322 = vmatprep.subr.bf16.mxu0 (!%p184_p3), %v1393_v1  ;;  %v1401_v9 = vld [vmem:[%s1952_s0 + $0x8] sm:$0xff] (!%p184_p3)   ;;  %v1402_v10 = vld [vmem:[%s1952_s0 + $0x10] sm:$0xff] (!%p184_p3)   ;;  %v1403_v11 = vld [vmem:[%s1952_s0 + $0x18] sm:$0xff] (!%p184_p3)  }
   0xa   : > { %v1404_v12 = vld [vmem:[%s1952_s0 + $0x20] sm:$0xff] (!%p184_p3)   ;;  %v1405_v13 = vld [vmem:[%s1952_s0 + $0x28] sm:$0xff] (!%p184_p3)   ;;  %v1406_v14 = vld [vmem:[%s1952_s0 + $0x30] sm:$0xff] (!%p184_p3)  }
   0xb   : > { %v1407_v15 = vld [vmem:[%s1952_s0 + $0x38] sm:$0xff] (!%p184_p3)   ;;  %v1408_v16 = vld [vmem:[%s1952_s0 + $0x40] sm:$0xff] (!%p184_p3)   ;;  %v1409_v17 = vld [vmem:[%s1952_s0 + $0x48] sm:$0xff] (!%p184_p3)  }
   0xc   : > { %1323 = vmatpush3.bf16.msra.mxu0 (!%p184_p3), %v1393_v1  ;;  %v1410_v18 = vld [vmem:[%s1952_s0 + $0x50] sm:$0xff] (!%p184_p3)   ;;  %v1411_v19 = vld [vmem:[%s1952_s0 + $0x58] sm:$0xff] (!%p184_p3)   ;;  %v1412_v20 = vld [vmem:[%s1952_s0 + $0x60] sm:$0xff] (!%p184_p3)  }
   0xd   : > { %1324 = vmatprep.subr.bf16.mxu0 (!%p184_p3), %v1394_v2  ;;  %v1413_v21 = vld [vmem:[%s1952_s0 + $0x68] sm:$0xff] (!%p184_p3)   ;;  %v1414_v22 = vld [vmem:[%s1952_s0 + $0x70] sm:$0xff] (!%p184_p3)   ;;  %v1415_v23 = vld [vmem:[%s1952_s0 + $0x78] sm:$0xff] (!%p184_p3)  }
   0xe   : > { %s1962_s23 = smov (!%p216_p4, %s1183_s23), 31 }
   0xf   : > { %s1231_s24 = sshll.u32 %s1962_s23, 3 }
  0x10   : > { %1325 = vmatpush3.bf16.msra.mxu0 %v1394_v2  ;;  %s1654_s27 = scalar_lea.vmem %s1954_s2, %s1231_s24  ;;  %s1895_s5 = scalar_lea.vmem %s1956_s4, %s1231_s24 }
  0x11   : > { %1326 = vmatprep.subr.bf16.mxu0 %v1395_v3  ;;  %v1418_v24 = vld [vmem:[%s1654_s27 + $0x4] ss:$8 sps:$4 sm:$0xff]  }
  0x12   : > { %778 = vmatprep.mubr.bf16.mxu1 %v1418_v24  ;;  %v894_v24 = vlaneseq }
  0x14   : > { %1327 = vmatpush3.bf16.msra.mxu0 %v1395_v3 }
  0x15   : > { %1328 = vmatprep.subr.bf16.mxu0 %v1396_v5 }
  0x18   : > { %1329 = vmatpush3.bf16.msra.mxu0 %v1396_v5 }
  0x19   : > { %1330 = vmatprep.subr.bf16.mxu0 %v1397_v6 }
  0x1c   : > { %1331 = vmatpush3.bf16.msra.mxu0 %v1397_v6 }
  0x1d   : > { %1332 = vmatprep.subr.bf16.mxu0 %v1398_v7 }
  0x20   : > { %1333 = vmatpush3.bf16.msra.mxu0 %v1398_v7 }
  0x21   : > { %1334 = vmatprep.subr.bf16.mxu0 %v1399_v8 }
  0x24   : > { %1335 = vmatpush3.bf16.msra.mxu0 %v1399_v8 }
  0x27   : > { %1337 = vmatmul.mubr.bf16.vlgmr.msra.gmra.mrb[0].mxu0 %v1401_v9  ;;  %v1416_v9 = vld [vmem:[%s1654_s27] ss:$8 sps:$4 sm:$0xff]  }
  0x28   : > { %1340 = vmatprep.mubr.bf16.mxu0 %v1402_v10  ;;  %v1419_v10 = vld [vmem:[%s1654_s27 + $0x14] ss:$8 sps:$4 sm:$0xff]  }
  0x2f   : > { %1341 = vmatmul.mubr.bf16.gmra.mrb[4].mxu0 %v1403_v11  ;;  %v1421_v11 = vld [vmem:[%s1654_s27 + $0x10] ss:$8 sps:$4 sm:$0xff]  }
  0x30   : > { %1344 = vmatprep.mubr.bf16.mxu0 %v1404_v12  ;;  %v1422_v12 = vld [vmem:[%s1654_s27 + $0x24] ss:$8 sps:$4 sm:$0xff]  }
  0x37   : > { %1345 = vmatmul.mubr.bf16.gmra.mrb[8].mxu0 %v1405_v13  ;;  %v1424_v13 = vld [vmem:[%s1654_s27 + $0x20] ss:$8 sps:$4 sm:$0xff]  }
  0x38   : > { %1348 = vmatprep.mubr.bf16.mxu0 %v1406_v14  ;;  %v1425_v14 = vld [vmem:[%s1654_s27 + $0x34] ss:$8 sps:$4 sm:$0xff]  }
  0x3f   : > { %1349 = vmatmul.mubr.bf16.gmra.mrb[12].mxu0 %v1407_v15  ;;  %v1427_v15 = vld [vmem:[%s1654_s27 + $0x30] ss:$8 sps:$4 sm:$0xff]  }
  0x40   : > { %1352 = vmatprep.mubr.bf16.mxu0 %v1408_v16  ;;  %v1428_v16 = vld [vmem:[%s1654_s27 + $0x44] ss:$8 sps:$4 sm:$0xff]  }
  0x47   : > { %1353 = vmatmul.mubr.bf16.gmra.mrb[16].mxu0 %v1409_v17  ;;  %v1430_v17 = vld [vmem:[%s1654_s27 + $0x40] ss:$8 sps:$4 sm:$0xff]  }
  0x48   : > { %1356 = vmatprep.mubr.bf16.mxu0 %v1410_v18  ;;  %v1431_v18 = vld [vmem:[%s1654_s27 + $0x54] ss:$8 sps:$4 sm:$0xff]  }
  0x4f   : > { %1357 = vmatmul.mubr.bf16.gmra.mrb[20].mxu0 %v1411_v19  ;;  %v1433_v19 = vld [vmem:[%s1654_s27 + $0x50] ss:$8 sps:$4 sm:$0xff]  }
  0x50   : > { %1360 = vmatprep.mubr.bf16.mxu0 %v1412_v20  ;;  %v1434_v20 = vld [vmem:[%s1654_s27 + $0x64] ss:$8 sps:$4 sm:$0xff]  }
  0x57   : > { %1361 = vmatmul.mubr.bf16.gmra.mrb[24].mxu0 %v1413_v21  ;;  %v1436_v21 = vld [vmem:[%s1654_s27 + $0x60] ss:$8 sps:$4 sm:$0xff]  }
  0x58   : > { %1364 = vmatprep.mubr.bf16.mxu0 %v1414_v22  ;;  %v1437_v22 = vld [vmem:[%s1654_s27 + $0x74] ss:$8 sps:$4 sm:$0xff]  }
  0x5f   : > { %1365 = vmatmul.mubr.bf16.gmra.mrb[28].mxu0 %v1415_v23  ;;  %v1439_v23 = vld [vmem:[%s1654_s27 + $0x70] ss:$8 sps:$4 sm:$0xff]  }
  0xfa   : > { %v1338_v25 = vpop.f32.mrb[0].mxu0 }
  0xfb   : > { %v491_v26 = vpop.f32.mrb[1].mxu0 }
  0xfc   : > { %v1339_v27 = vpop.f32.mrb[2].mxu0 }
  0xfd   : > { %v619_v28 = vpack.c.bf16 %v1339_v27, %v1338_v25  ;;  %v494_v29 = vpop.f32.mrb[3].mxu0  ;;  %v1672_v25 = vand.u32 127, %v894_v24 }
  0xfe   : > { %v618_v30 = vpack.c.bf16 %v494_v29, %v491_v26 }
  0xff   : > { %vm896_vm0 = vcmp.lt.s32.totalorder %v1672_v25, 7 }
 0x102   : > { %v1342_v31 = vpop.f32.mrb[4].mxu0 }
 0x103   : > { %v507_v32 = vpop.f32.mrb[5].mxu0 }
 0x104   : > { %v1343_v33 = vpop.f32.mrb[6].mxu0 }
 0x105   : > { %v621_v34 = vpack.c.bf16 %v1343_v33, %v1342_v31  ;;  %v510_v35 = vpop.f32.mrb[7].mxu0 }
 0x106   : > { %v620_v36 = vpack.c.bf16 %v510_v35, %v507_v32 }
 0x10a   : > { %v1346_v37 = vpop.f32.mrb[8].mxu0 }
 0x10b   : > { %v523_v38 = vpop.f32.mrb[9].mxu0 }
 0x10c   : > { %v1347_v39 = vpop.f32.mrb[10].mxu0 }
 0x10d   : > { %v623_v40 = vpack.c.bf16 %v1347_v39, %v1346_v37  ;;  %v526_v41 = vpop.f32.mrb[11].mxu0 }
 0x10e   : > { %v622_v42 = vpack.c.bf16 %v526_v41, %v523_v38 }
 0x112   : > { %v1350_v43 = vpop.f32.mrb[12].mxu0 }
 0x113   : > { %v539_v44 = vpop.f32.mrb[13].mxu0 }
 0x114   : > { %v1351_v45 = vpop.f32.mrb[14].mxu0 }
 0x115   : > { %v625_v46 = vpack.c.bf16 %v1351_v45, %v1350_v43  ;;  %v542_v47 = vpop.f32.mrb[15].mxu0 }
 0x116   : > { %v624_v48 = vpack.c.bf16 %v542_v47, %v539_v44 }
 0x11a   : > { %v1354_v49 = vpop.f32.mrb[16].mxu0 }
 0x11b   : > { %v555_v50 = vpop.f32.mrb[17].mxu0 }
 0x11c   : > { %v1355_v51 = vpop.f32.mrb[18].mxu0 }
 0x11d   : > { %v627_v52 = vpack.c.bf16 %v1355_v51, %v1354_v49  ;;  %v558_v53 = vpop.f32.mrb[19].mxu0 }
 0x11e   : > { %v626_v54 = vpack.c.bf16 %v558_v53, %v555_v50 }
 0x120   : > { %1256 = vmatprep.subr.bf16.mxu1 %v626_v54 }
 0x121   : > { %1257 = vmatpush3.bf16.msra.mxu1 %v618_v30 }
 0x122   : > { %v1358_v55 = vpop.f32.mrb[20].mxu0  ;;  %1258 = vmatprep.subr.bf16.mxu1 %v627_v52 }
 0x123   : > { %v571_v56 = vpop.f32.mrb[21].mxu0 }
 0x124   : > { %v1359_v57 = vpop.f32.mrb[22].mxu0 }
 0x125   : > { %v629_v58 = vpack.c.bf16 %v1359_v57, %v1358_v55  ;;  %v574_v59 = vpop.f32.mrb[23].mxu0  ;;  %1259 = vmatpush3.bf16.msra.mxu1 %v619_v28  ;;  %v1677_v28 = vld [vmem:[%s1955_s3] ss:$0 sm:$0xff] }
 0x126   : > { %v628_v60 = vpack.c.bf16 %v574_v59, %v571_v56 }
 0x128   : > { %1260 = vmatprep.subr.bf16.mxu1 %v628_v60 }
 0x129   : > { %1261 = vmatpush3.bf16.msra.mxu1 %v620_v36 }
 0x12a   : > { %v1362_v61 = vpop.f32.mrb[24].mxu0  ;;  %1262 = vmatprep.subr.bf16.mxu1 %v629_v58 }
 0x12b   : > { %v587_v62 = vpop.f32.mrb[25].mxu0 }
 0x12c   : > { %v1363_v63 = vpop.f32.mrb[26].mxu0 }
 0x12d   : > { %v631_v0 = vpack.c.bf16 %v1363_v63, %v1362_v61  ;;  %v590_v1 = vpop.f32.mrb[27].mxu0  ;;  %1263 = vmatpush3.bf16.msra.mxu1 %v621_v34 }
 0x12e   : > { %v630_v2 = vpack.c.bf16 %v590_v1, %v587_v62 }
 0x130   : > { %1264 = vmatprep.subr.bf16.mxu1 %v630_v2 }
 0x131   : > { %1265 = vmatpush3.bf16.msra.mxu1 %v622_v42 }
 0x132   : > { %v1366_v3 = vpop.f32.mrb[28].mxu0  ;;  %1266 = vmatprep.subr.bf16.mxu1 %v631_v0 }
 0x133   : > { %v603_v4 = vpop.f32.mrb[29].mxu0 }
 0x134   : > { %v1367_v5 = vpop.f32.mrb[30].mxu0 }
 0x135   : > { %v633_v6 = vpack.c.bf16 %v1367_v5, %v1366_v3  ;;  %v606_v7 = vpop.f32.mrb[31].mxu0  ;;  %1267 = vmatpush3.bf16.msra.mxu1 %v623_v40 }
 0x136   : > { %v632_v8 = vpack.c.bf16 %v606_v7, %v603_v4 }
 0x138   : > { %1268 = vmatprep.subr.bf16.mxu1 %v632_v8 }
 0x139   : > { %1269 = vmatpush3.bf16.msra.mxu1 %v624_v48 }
 0x13a   : > { %1270 = vmatprep.subr.bf16.mxu1 %v633_v6 }
 0x13d   : > { %1271 = vmatpush3.bf16.msra.mxu1 %v625_v46 }
 0x140   : > { %779 = vmatmul.mubr.bf16.vlgmr.msra.gmra.mrb[0].mxu1 %v1416_v9 }
 0x141   : > { %786 = vmatprep.mubr.bf16.mxu1 %v1419_v10 }
 0x148   : > { %787 = vmatmul.mubr.bf16.gmra.mrb[4].mxu1 %v1421_v11 }
 0x149   : > { %794 = vmatprep.mubr.bf16.mxu1 %v1422_v12 }
 0x150   : > { %795 = vmatmul.mubr.bf16.gmra.mrb[8].mxu1 %v1424_v13 }
 0x151   : > { %802 = vmatprep.mubr.bf16.mxu1 %v1425_v14 }
 0x158   : > { %803 = vmatmul.mubr.bf16.gmra.mrb[12].mxu1 %v1427_v15 }
 0x159   : > { %810 = vmatprep.mubr.bf16.mxu1 %v1428_v16 }
 0x160   : > { %811 = vmatmul.mubr.bf16.gmra.mrb[16].mxu1 %v1430_v17 }
 0x161   : > { %818 = vmatprep.mubr.bf16.mxu1 %v1431_v18 }
 0x168   : > { %819 = vmatmul.mubr.bf16.gmra.mrb[20].mxu1 %v1433_v19 }
 0x169   : > { %826 = vmatprep.mubr.bf16.mxu1 %v1434_v20 }
 0x170   : > { %827 = vmatmul.mubr.bf16.gmra.mrb[24].mxu1 %v1436_v21 }
 0x171   : > { %834 = vmatprep.mubr.bf16.mxu1 %v1437_v22 }
 0x178   : > { %835 = vmatmul.mubr.bf16.gmra.mrb[28].mxu1 %v1439_v23 }
 0x213   : > { %v1272_v26 = vpop.f32.mrb[0].mxu1 }
 0x214   : > { %v1273_v27 = vpop.f32.mrb[1].mxu1 }
 0x215   : > { %v1274_v29 = vadd.f32 %v1273_v27, %v1272_v26  ;;  %v1275_v30 = vpop.f32.mrb[2].mxu1 }
 0x216   : > { %v1276_v31 = vpop.f32.mrb[3].mxu1 }
 0x217   : > { %v1277_v32 = vadd.f32 %v1276_v31, %v1275_v30  ;;  %v1681_v33 = vadd.f32 %v1274_v29, %v1677_v28 }
 0x219   : > { %v1686_v34 = vsel %vm896_vm0, %v1681_v33, -inf  ;;  %v1689_v35 = vadd.f32 %v1277_v32, %v1677_v28 }
 0x21a   : > { %913 = vmax.xlane.f32.xlu0 %v1686_v34 }
 0x21b   : > { %v1278_v36 = vpop.f32.mrb[4].mxu1  ;;  %v1695_v40 = vsel %vm896_vm0, %v1689_v35, -inf }
 0x21c   : > { %v1279_v37 = vpop.f32.mrb[5].mxu1 }
 0x21d   : > { %v1280_v38 = vadd.f32 %v1279_v37, %v1278_v36  ;;  %v1281_v39 = vpop.f32.mrb[6].mxu1 }
 0x21e   : > { %v1282_v41 = vpop.f32.mrb[7].mxu1  ;;  %915 = vmax.xlane.f32.xlu0 %v1695_v40 }
 0x21f   : > { %v1283_v42 = vadd.f32 %v1282_v41, %v1281_v39  ;;  %v1699_v43 = vadd.f32 %v1280_v38, %v1677_v28 }
 0x221   : > { %v1704_v44 = vsel %vm896_vm0, %v1699_v43, -inf  ;;  %v1707_v45 = vadd.f32 %v1283_v42, %v1677_v28 }
 0x222   : > { %917 = vmax.xlane.f32.xlu1 %v1704_v44 }
 0x223   : > { %v1284_v46 = vpop.f32.mrb[8].mxu1  ;;  %v1713_v50 = vsel %vm896_vm0, %v1707_v45, -inf }
 0x224   : > { %v1285_v47 = vpop.f32.mrb[9].mxu1 }
 0x225   : > { %v1286_v48 = vadd.f32 %v1285_v47, %v1284_v46  ;;  %v1287_v49 = vpop.f32.mrb[10].mxu1 }
 0x226   : > { %v1288_v51 = vpop.f32.mrb[11].mxu1  ;;  %919 = vmax.xlane.f32.xlu1 %v1713_v50 }
 0x227   : > { %v1289_v52 = vadd.f32 %v1288_v51, %v1287_v49  ;;  %v1717_v53 = vadd.f32 %v1286_v48, %v1677_v28 }
 0x229   : > { %v1722_v54 = vsel %vm896_vm0, %v1717_v53, -inf  ;;  %v1725_v55 = vadd.f32 %v1289_v52, %v1677_v28 }
 0x22a   : > { %921 = vmax.xlane.f32.xlu0 %v1722_v54 }
 0x22b   : > { %v1290_v56 = vpop.f32.mrb[12].mxu1  ;;  %v1731_v57 = vsel %vm896_vm0, %v1725_v55, -inf }
 0x22c   : > { %v1291_v58 = vpop.f32.mrb[13].mxu1  ;;  %923 = vmax.xlane.f32.xlu1 %v1731_v57 }
 0x22d   : > { %v1292_v59 = vadd.f32 %v1291_v58, %v1290_v56  ;;  %v1293_v60 = vpop.f32.mrb[14].mxu1 }
 0x22e   : > { %v1294_v61 = vpop.f32.mrb[15].mxu1 }
 0x22f   : > { %v1295_v62 = vadd.f32 %v1294_v61, %v1293_v60  ;;  %v1735_v63 = vadd.f32 %v1292_v59, %v1677_v28 }
 0x231   : > { %v1740_v0 = vsel %vm896_vm0, %v1735_v63, -inf  ;;  %v1743_v1 = vadd.f32 %v1295_v62, %v1677_v28 }
 0x232   : > { %925 = vmax.xlane.f32.xlu0 %v1740_v0 }
 0x233   : > { %v1296_v2 = vpop.f32.mrb[16].mxu1  ;;  %v1749_v3 = vsel %vm896_vm0, %v1743_v1, -inf }
 0x234   : > { %v1297_v4 = vpop.f32.mrb[17].mxu1  ;;  %927 = vmax.xlane.f32.xlu1 %v1749_v3 }
 0x235   : > { %v1298_v5 = vadd.f32 %v1297_v4, %v1296_v2  ;;  %v1299_v6 = vpop.f32.mrb[18].mxu1 }
 0x236   : > { %v1300_v7 = vpop.f32.mrb[19].mxu1 }
 0x237   : > { %v1301_v8 = vadd.f32 %v1300_v7, %v1299_v6  ;;  %v1753_v9 = vadd.f32 %v1298_v5, %v1677_v28 }
 0x239   : > { %v1758_v10 = vsel %vm896_vm0, %v1753_v9, -inf  ;;  %v1761_v11 = vadd.f32 %v1301_v8, %v1677_v28 }
 0x23a   : > { %929 = vmax.xlane.f32.xlu0 %v1758_v10 }
 0x23b   : > { %v1302_v12 = vpop.f32.mrb[20].mxu1  ;;  %v1767_v13 = vsel %vm896_vm0, %v1761_v11, -inf }
 0x23c   : > { %v1303_v14 = vpop.f32.mrb[21].mxu1  ;;  %931 = vmax.xlane.f32.xlu1 %v1767_v13 }
 0x23d   : > { %v1304_v15 = vadd.f32 %v1303_v14, %v1302_v12  ;;  %v1305_v16 = vpop.f32.mrb[22].mxu1 }
 0x23e   : > { %v1306_v17 = vpop.f32.mrb[23].mxu1 }
 0x23f   : > { %v1307_v18 = vadd.f32 %v1306_v17, %v1305_v16  ;;  %v1771_v19 = vadd.f32 %v1304_v15, %v1677_v28 }
 0x241   : > { %v1776_v20 = vsel %vm896_vm0, %v1771_v19, -inf  ;;  %v1779_v21 = vadd.f32 %v1307_v18, %v1677_v28 }
 0x242   : > { %933 = vmax.xlane.f32.xlu0 %v1776_v20 }
 0x243   : > { %v1308_v22 = vpop.f32.mrb[24].mxu1  ;;  %v1785_v23 = vsel %vm896_vm0, %v1779_v21, -inf }
 0x244   : > { %v1309_v24 = vpop.f32.mrb[25].mxu1  ;;  %935 = vmax.xlane.f32.xlu1 %v1785_v23 }
 0x245   : > { %v1310_v26 = vadd.f32 %v1309_v24, %v1308_v22  ;;  %v1311_v27 = vpop.f32.mrb[26].mxu1 }
 0x246   : > { %v1312_v29 = vpop.f32.mrb[27].mxu1 }
 0x247   : > { %v1313_v30 = vadd.f32 %v1312_v29, %v1311_v27  ;;  %v1789_v31 = vadd.f32 %v1310_v26, %v1677_v28 }
 0x249   : > { %v1794_v32 = vsel %vm896_vm0, %v1789_v31, -inf  ;;  %v1797_v36 = vadd.f32 %v1313_v30, %v1677_v28 }
 0x24a   : > { %937 = vmax.xlane.f32.xlu0 %v1794_v32 }
 0x24b   : > { %v1314_v37 = vpop.f32.mrb[28].mxu1  ;;  %v1803_v38 = vsel %vm896_vm0, %v1797_v36, -inf }
 0x24c   : > { %v1315_v39 = vpop.f32.mrb[29].mxu1  ;;  %939 = vmax.xlane.f32.xlu1 %v1803_v38 }
 0x24d   : > { %v1316_v41 = vadd.f32 %v1315_v39, %v1314_v37  ;;  %v1317_v42 = vpop.f32.mrb[30].mxu1 }
 0x24e   : > { %v1318_v46 = vpop.f32.mrb[31].mxu1 }
 0x24f   : > { %v1319_v47 = vadd.f32 %v1318_v46, %v1317_v42  ;;  %v1807_v48 = vadd.f32 %v1316_v41, %v1677_v28 }
 0x251   : > { %v1812_v49 = vsel %vm896_vm0, %v1807_v48, -inf  ;;  %v1815_v51 = vadd.f32 %v1319_v47, %v1677_v28 }
 0x252   : > { %941 = vmax.xlane.f32.xlu0 %v1812_v49 }
 0x253   : > { %v1821_v52 = vsel %vm896_vm0, %v1815_v51, -inf }
 0x254   : > { %943 = vmax.xlane.f32.xlu1 %v1821_v52 }
 0x2a7   : > { %v1824_v56 = vpop.xlane.xlu0 %913 }
 0x2a8   : > { %v945_v58 = vsub.f32 %v1686_v34, %v1824_v56 }
 0x2aa   : > { %v961_v59 = vmul.f32 1.442695, %v945_v58 }
 0x2ab   : > { %v1828_v60 = vpop.xlane.xlu0 %915 }
 0x2ac   : > { %1440 = vpow2.f32 %v961_v59  ;;  %v946_v28 = vsub.f32 %v1695_v40, %v1828_v60 }
 0x2ae   : > { %v963_v61 = vmul.f32 1.442695, %v946_v28 }
 0x2af   : > { %v1832_v62 = vpop.xlane.xlu1 %917 }
 0x2b0   : > { %1442 = vpow2.f32 %v963_v61  ;;  %v947_v25 = vsub.f32 %v1704_v44, %v1832_v62 }
 0x2b2   : > { %v965_v2 = vmul.f32 1.442695, %v947_v25 }
 0x2b3   : > { %v1836_v4 = vpop.xlane.xlu1 %919 }
 0x2b4   : > { %1444 = vpow2.f32 %v965_v2  ;;  %v948_v34 = vsub.f32 %v1713_v50, %v1836_v4 }
 0x2b6   : > { %v1441_v5 = vpop.eup %1440  ;;  %v967_v6 = vmul.f32 1.442695, %v948_v34 }
 0x2b7   : > { %993 = vadd.xlane.f32.xlu0 %v1441_v5  ;;  %v1840_v7 = vpop.xlane.xlu0 %921 }
 0x2b8   : > { %1446 = vpow2.f32 %v967_v6  ;;  %v949_v40 = vsub.f32 %v1722_v54, %v1840_v7 }
 0x2b9   : > { %v1844_v8 = vpop.xlane.xlu1 %923 }
 0x2ba   : > { %v1443_v12 = vpop.eup %1442  ;;  %v969_v44 = vmul.f32 1.442695, %v949_v40  ;;  %v950_v14 = vsub.f32 %v1731_v57, %v1844_v8 }
 0x2bb   : > { %995 = vadd.xlane.f32.xlu1 %v1443_v12 }
 0x2bc   : > { %1448 = vpow2.f32 %v969_v44  ;;  %v971_v15 = vmul.f32 1.442695, %v950_v14 }
 0x2be   : > { %v1445_v50 = vpop.eup %1444  ;;  %1450 = vpow2.f32 %v971_v15 }
 0x2bf   : > { %997 = vadd.xlane.f32.xlu0 %v1445_v50  ;;  %v1848_v16 = vpop.xlane.xlu0 %925 }
 0x2c0   : > { %v951_v17 = vsub.f32 %v1740_v0, %v1848_v16 }
 0x2c1   : > { %v1852_v18 = vpop.xlane.xlu1 %927 }
 0x2c2   : > { %v1447_v54 = vpop.eup %1446  ;;  %v973_v22 = vmul.f32 1.442695, %v951_v17  ;;  %v952_v24 = vsub.f32 %v1749_v3, %v1852_v18 }
 0x2c3   : > { %999 = vadd.xlane.f32.xlu1 %v1447_v54 }
 0x2c4   : > { %1452 = vpow2.f32 %v973_v22  ;;  %v975_v57 = vmul.f32 1.442695, %v952_v24 }
 0x2c6   : > { %v1449_v26 = vpop.eup %1448  ;;  %1454 = vpow2.f32 %v975_v57 }
 0x2c7   : > { %1001 = vadd.xlane.f32.xlu0 %v1449_v26  ;;  %v1856_v27 = vpop.xlane.xlu0 %929 }
 0x2c8   : > { %v1451_v29 = vpop.eup %1450  ;;  %v953_v30 = vsub.f32 %v1758_v10, %v1856_v27 }
 0x2c9   : > { %v1860_v0 = vpop.xlane.xlu1 %931  ;;  %1003 = vadd.xlane.f32.xlu1 %v1451_v29 }
 0x2ca   : > { %v977_v37 = vmul.f32 1.442695, %v953_v30  ;;  %v954_v39 = vsub.f32 %v1767_v13, %v1860_v0 }
 0x2cc   : > { %1456 = vpow2.f32 %v977_v37  ;;  %v979_v3 = vmul.f32 1.442695, %v954_v39 }
 0x2ce   : > { %v1453_v41 = vpop.eup %1452  ;;  %1458 = vpow2.f32 %v979_v3  ;;  %v1058_v3 = vsub.f32 %v1689_v35, %v1828_v60 }
 0x2cf   : > { %1005 = vadd.xlane.f32.xlu0 %v1453_v41  ;;  %v1864_v42 = vpop.xlane.xlu0 %933 }
 0x2d0   : > { %v1455_v46 = vpop.eup %1454  ;;  %v955_v47 = vsub.f32 %v1776_v20, %v1864_v42 }
 0x2d1   : > { %v1868_v58 = vpop.xlane.xlu1 %935  ;;  %1007 = vadd.xlane.f32.xlu1 %v1455_v46 }
 0x2d2   : > { %v981_v10 = vmul.f32 1.442695, %v955_v47  ;;  %v956_v59 = vsub.f32 %v1785_v23, %v1868_v58 }
 0x2d4   : > { %1460 = vpow2.f32 %v981_v10  ;;  %v983_v13 = vmul.f32 1.442695, %v956_v59  ;;  %v1059_v10 = vsub.f32 %v1699_v43, %v1832_v62  ;;  %v1061_v43 = vsub.f32 %v1717_v53, %v1840_v7 }
 0x2d5   : > { %v1063_v53 = vsub.f32 %v1735_v63, %v1848_v16  ;;  %v1065_v63 = vsub.f32 %v1753_v9, %v1856_v27  ;;  %v1067_v9 = vsub.f32 %v1771_v19, %v1864_v42 }
 0x2d6   : > { %v1457_v28 = vpop.eup %1456  ;;  %1462 = vpow2.f32 %v983_v13 }
 0x2d7   : > { %1009 = vadd.xlane.f32.xlu0 %v1457_v28  ;;  %v1872_v61 = vpop.xlane.xlu0 %937 }
 0x2d8   : > { %v1459_v25 = vpop.eup %1458  ;;  %v957_v2 = vsub.f32 %v1794_v32, %v1872_v61  ;;  %v1069_v19 = vsub.f32 %v1789_v31, %v1872_v61 }
 0x2d9   : > { %v1876_v34 = vpop.xlane.xlu1 %939  ;;  %1011 = vadd.xlane.f32.xlu1 %v1459_v25  ;;  %v1060_v25 = vsub.f32 %v1707_v45, %v1836_v4 }
 0x2da   : > { %v985_v20 = vmul.f32 1.442695, %v957_v2  ;;  %v958_v5 = vsub.f32 %v1803_v38, %v1876_v34 }
 0x2dc   : > { %1464 = vpow2.f32 %v985_v20  ;;  %v987_v23 = vmul.f32 1.442695, %v958_v5 }
 0x2de   : > { %v1461_v6 = vpop.eup %1460  ;;  %1466 = vpow2.f32 %v987_v23 }
 0x2df   : > { %1013 = vadd.xlane.f32.xlu0 %v1461_v6  ;;  %v1880_v40 = vpop.xlane.xlu0 %941  ;;  %v1062_v6 = vsub.f32 %v1725_v55, %v1844_v8  ;;  %v1064_v55 = vsub.f32 %v1743_v1, %v1852_v18  ;;  %v1066_v1 = vsub.f32 %v1761_v11, %v1860_v0  ;;  %v1068_v11 = vsub.f32 %v1779_v21, %v1868_v58 }
 0x2e0   : > { %v1463_v12 = vpop.eup %1462  ;;  %v959_v44 = vsub.f32 %v1812_v49, %v1880_v40  ;;  %v1070_v21 = vsub.f32 %v1797_v36, %v1876_v34 }
 0x2e1   : > { %v1884_v14 = vpop.xlane.xlu1 %943  ;;  %1015 = vadd.xlane.f32.xlu1 %v1463_v12 }
 0x2e2   : > { %v989_v32 = vmul.f32 1.442695, %v959_v44  ;;  %v960_v15 = vsub.f32 %v1821_v52, %v1884_v14  ;;  %v1057_v52 = vsub.f32 %v1681_v33, %v1824_v56  ;;  %v1072_v31 = vsub.f32 %v1815_v51, %v1884_v14 }
 0x2e4   : > { %1468 = vpow2.f32 %v989_v32  ;;  %v991_v38 = vmul.f32 1.442695, %v960_v15 }
 0x2e6   : > { %v1465_v50 = vpop.eup %1464  ;;  %1470 = vpow2.f32 %v991_v38 }
 0x2e7   : > { %1017 = vadd.xlane.f32.xlu0 %v1465_v50 }
 0x2e8   : > { %v1467_v17 = vpop.eup %1466 }
 0x2e9   : > { %1019 = vadd.xlane.f32.xlu1 %v1467_v17 }
 0x2ee   : > { %v1469_v54 = vpop.eup %1468 }
 0x2ef   : > { %1021 = vadd.xlane.f32.xlu0 %v1469_v54 }
 0x2f0   : > { %v1471_v22 = vpop.eup %1470 }
 0x2f1   : > { %1023 = vadd.xlane.f32.xlu1 %v1471_v22 }
 0x344   : > { %v994_v49 = vpop.xlane.xlu0 %993 }
 0x345   : > { %1472 = vlog2.f32 %v994_v49 }
 0x348   : > { %v996_v24 = vpop.xlane.xlu1 %995 }
 0x349   : > { %1474 = vlog2.f32 %v996_v24 }
 0x34c   : > { %v998_v57 = vpop.xlane.xlu0 %997 }
 0x34d   : > { %1476 = vlog2.f32 %v998_v57 }
 0x34f   : > { %v1473_v26 = vpop.eup %1472 }
 0x350   : > { %v1026_v29 = vmul.f32 0.6931472, %v1473_v26  ;;  %v1000_v30 = vpop.xlane.xlu1 %999 }
 0x351   : > { %1478 = vlog2.f32 %v1000_v30 }
 0x352   : > { %v1073_v37 = vsub.f32 %v1057_v52, %v1026_v29 }
 0x353   : > { %v1475_v39 = vpop.eup %1474 }
 0x354   : > { %1089 = vst [vmem:[%s1895_s5] sm:$0xff] %v1073_v37  ;;  %v1028_v41 = vmul.f32 0.6931472, %v1475_v39  ;;  %v1002_v33 = vpop.xlane.xlu0 %1001 }
 0x355   : > { %1480 = vlog2.f32 %v1002_v33 }
 0x356   : > { %v1074_v56 = vsub.f32 %v1058_v3, %v1028_v41  ;;  %v1004_v46 = vpop.xlane.xlu1 %1003 }
 0x357   : > { %v1477_v47 = vpop.eup %1476  ;;  %1482 = vlog2.f32 %v1004_v46 }
 0x358   : > { %1090 = vst [vmem:[%s1895_s5 + $0x8] sm:$0xff] %v1074_v56  ;;  %v1030_v59 = vmul.f32 0.6931472, %v1477_v47 }
 0x35a   : > { %v1075_v13 = vsub.f32 %v1059_v10, %v1030_v59 }
 0x35b   : > { %v1479_v28 = vpop.eup %1478 }
 0x35c   : > { %1091 = vst [vmem:[%s1895_s5 + $0x10] sm:$0xff] %v1075_v13  ;;  %v1032_v35 = vmul.f32 0.6931472, %v1479_v28  ;;  %v1006_v60 = vpop.xlane.xlu0 %1005  ;;  %v1071_v13 = vsub.f32 %v1807_v48, %v1880_v40 }
 0x35d   : > { %1484 = vlog2.f32 %v1006_v60 }
 0x35e   : > { %v1076_v2 = vsub.f32 %v1060_v25, %v1032_v35  ;;  %v1008_v20 = vpop.xlane.xlu1 %1007 }
 0x35f   : > { %v1481_v5 = vpop.eup %1480  ;;  %1486 = vlog2.f32 %v1008_v20 }
 0x360   : > { %1092 = vst [vmem:[%s1895_s5 + $0x18] sm:$0xff] %v1076_v2  ;;  %v1034_v62 = vmul.f32 0.6931472, %v1481_v5 }
 0x361   : > { %v1483_v23 = vpop.eup %1482 }
 0x362   : > { %v1077_v45 = vsub.f32 %v1061_v43, %v1034_v62  ;;  %v1036_v4 = vmul.f32 0.6931472, %v1483_v23 }
 0x364   : > { %1093 = vst [vmem:[%s1895_s5 + $0x20] sm:$0xff] %v1077_v45  ;;  %v1078_v12 = vsub.f32 %v1062_v6, %v1036_v4  ;;  %v1010_v44 = vpop.xlane.xlu0 %1009 }
 0x365   : > { %1488 = vlog2.f32 %v1010_v44 }
 0x366   : > { %1094 = vst [vmem:[%s1895_s5 + $0x28] sm:$0xff] %v1078_v12  ;;  %v1012_v32 = vpop.xlane.xlu1 %1011 }
 0x367   : > { %v1485_v15 = vpop.eup %1484  ;;  %1490 = vlog2.f32 %v1012_v32 }
 0x368   : > { %v1038_v7 = vmul.f32 0.6931472, %v1485_v15 }
 0x369   : > { %v1487_v38 = vpop.eup %1486 }
 0x36a   : > { %v1079_v8 = vsub.f32 %v1063_v53, %v1038_v7  ;;  %v1040_v50 = vmul.f32 0.6931472, %v1487_v38 }
 0x36c   : > { %1095 = vst [vmem:[%s1895_s5 + $0x30] sm:$0xff] %v1079_v8  ;;  %v1080_v17 = vsub.f32 %v1064_v55, %v1040_v50  ;;  %v1014_v54 = vpop.xlane.xlu0 %1013 }
 0x36d   : > { %1492 = vlog2.f32 %v1014_v54 }
 0x36e   : > { %1096 = vst [vmem:[%s1895_s5 + $0x38] sm:$0xff] %v1080_v17  ;;  %v1016_v22 = vpop.xlane.xlu1 %1015 }
 0x36f   : > { %v1489_v49 = vpop.eup %1488  ;;  %1494 = vlog2.f32 %v1016_v22 }
 0x370   : > { %v1042_v16 = vmul.f32 0.6931472, %v1489_v49 }
 0x371   : > { %v1491_v24 = vpop.eup %1490 }
 0x372   : > { %v1081_v18 = vsub.f32 %v1065_v63, %v1042_v16  ;;  %v1044_v57 = vmul.f32 0.6931472, %v1491_v24 }
 0x374   : > { %1097 = vst [vmem:[%s1895_s5 + $0x40] sm:$0xff] %v1081_v18  ;;  %v1082_v26 = vsub.f32 %v1066_v1, %v1044_v57  ;;  %v1018_v52 = vpop.xlane.xlu0 %1017 }
 0x375   : > { %1496 = vlog2.f32 %v1018_v52 }
 0x376   : > { %1098 = vst [vmem:[%s1895_s5 + $0x48] sm:$0xff] %v1082_v26  ;;  %v1020_v29 = vpop.xlane.xlu1 %1019 }
 0x377   : > { %v1493_v30 = vpop.eup %1492  ;;  %1498 = vlog2.f32 %v1020_v29 }
 0x378   : > { %v1046_v27 = vmul.f32 0.6931472, %v1493_v30 }
 0x379   : > { %v1495_v37 = vpop.eup %1494 }
 0x37a   : > { %v1083_v0 = vsub.f32 %v1067_v9, %v1046_v27  ;;  %v1048_v39 = vmul.f32 0.6931472, %v1495_v37 }
 0x37c   : > { %1099 = vst [vmem:[%s1895_s5 + $0x50] sm:$0xff] %v1083_v0  ;;  %v1084_v3 = vsub.f32 %v1068_v11, %v1048_v39  ;;  %v1022_v41 = vpop.xlane.xlu0 %1021 }
 0x37d   : > { %1500 = vlog2.f32 %v1022_v41 }
 0x37e   : > { %1100 = vst [vmem:[%s1895_s5 + $0x58] sm:$0xff] %v1084_v3  ;;  %v1024_v33 = vpop.xlane.xlu1 %1023 }
 0x37f   : > { %v1497_v56 = vpop.eup %1496  ;;  %1502 = vlog2.f32 %v1024_v33 }
 0x380   : > { %v1050_v42 = vmul.f32 0.6931472, %v1497_v56 }
 0x381   : > { %v1499_v46 = vpop.eup %1498 }
 0x382   : > { %v1085_v58 = vsub.f32 %v1069_v19, %v1050_v42  ;;  %v1052_v47 = vmul.f32 0.6931472, %v1499_v46 }
 0x384   : > { %1101 = vst [vmem:[%s1895_s5 + $0x60] sm:$0xff] %v1085_v58  ;;  %v1086_v10 = vsub.f32 %v1070_v21, %v1052_v47 }
 0x386   : > { %1102 = vst [vmem:[%s1895_s5 + $0x68] sm:$0xff] %v1086_v10 }
 0x387   : > { %v1501_v59 = vpop.eup %1500 }
 0x388   : > { %v1054_v28 = vmul.f32 0.6931472, %v1501_v59 }
 0x389   : > { %v1503_v25 = vpop.eup %1502 }
 0x38a   : > { %v1087_v61 = vsub.f32 %v1071_v13, %v1054_v28  ;;  %v1056_v35 = vmul.f32 0.6931472, %v1503_v25 }
 0x38c   : > { %1103 = vst [vmem:[%s1895_s5 + $0x70] sm:$0xff] %v1087_v61  ;;  %v1088_v60 = vsub.f32 %v1072_v31, %v1056_v35 }
 0x38e   : > { %1104 = vst [vmem:[%s1895_s5 + $0x78] sm:$0xff] %v1088_v60 }
 0x38f PF: > { %s14_s17 = sadd.s32 1, %s1526_s17   ;;  %s1957_s15 = smov %s1522_s16 }
 0x390   : > { %p11_p5 = scmp.ge.s32.totalorder %s14_s17, 4   ;;  %s1958_s16 = smov %s1960_s18 }
 0x392   :  { %13 = sbr.rel (!%p11_p5) target bundleno = 2 (0x2), region = 75 }

</bundles_post_ra>
